<compile_context>
chip_gen: v6e
topology: v6e:2x2x1
jax: 0.10.0
libtpu: 0.0.40
codegen_flags: <defaults>
</compile_context>

<pallas_src>
import functools

import jax
import jax.numpy as jnp
from jax.experimental import pallas as pl
from jax.experimental.pallas import tpu as pltpu

LANE, SUB = 128, 8


def _round_up(x, m):
    return (x + m - 1) // m * m


def _textcnn_kernel(ks_max, l_pad, s_pad, text_ref, embed_ref, w_ref, bm_ref,
                    wfc_ref, bfc_ref, out_ref):
    """text[block_b*S_pad,1](i32), embed[Vp,E](bf16), w[ks_max*E,NKp](bf16),
    bias_mask[L_pad,NKp](f32), wfc[NKp,Cp](f32), bfc[1,Cp](f32) -> out[block_b,Cp](f32)."""
    rows = text_ref.shape[0]            # block_b * s_pad
    tb = rows // s_pad
    vp, e = embed_ref.shape
    nkp = w_ref.shape[1]

    # ---- fused embedding gather: one-hot MXU matmul (exact bf16 row select) ----
    idx = text_ref[...]                                                  # [rows, 1] i32
    iota = jax.lax.broadcasted_iota(jnp.int32, (rows, vp), 1)
    one_hot = (idx == iota).astype(jnp.bfloat16)                         # [rows, Vp]
    x = jnp.dot(one_hot, embed_ref[...],
                preferred_element_type=jnp.float32)                      # [rows, E]
    x = x.astype(jnp.bfloat16).reshape(tb, s_pad, e)                     # tile-aligned

    # ---- conv for all kernel sizes: ks_max shifted matmul accumulations ----
    # (no im2col materialization; tap s multiplies weight rows s*E:(s+1)*E)
    # TODO(synk): for small E the x operand is lane-sparse (E=32 of 128 lanes); fold
    # positions into lanes if E stays small and block_b/S scale a lot.
    w = w_ref[...]                                                       # [ks_max*E, NKp]
    acc = jnp.zeros((tb * l_pad, nkp), jnp.float32)
    for s in range(ks_max):
        xs = x[:, s:s + l_pad, :].reshape(tb * l_pad, e)
        acc = acc + jnp.dot(xs, w[s * e:(s + 1) * e, :],
                            preferred_element_type=jnp.float32)
    acc = acc.reshape(tb, l_pad, nkp)

    # ---- bias + position-validity mask (-1e30) + ReLU, then global max-pool ----
    # NOTE: the -1e30 mask is only correct because ReLU clamps masked positions to
    # exactly 0, which can never beat the (>= 0) valid maximum. Do not swap ReLU for
    # an activation that can go negative without changing the masking scheme.
    y = jnp.maximum(acc + bm_ref[...][None, :, :], 0.0)                  # [tb, L_pad, NKp]
    feat = jnp.max(y, axis=1)                                            # [tb, NKp] f32

    # ---- FC epilogue in f32 (no precision-losing bf16 cast of features) ----
    logits = jnp.dot(feat, wfc_ref[...],
                     preferred_element_type=jnp.float32) + bfc_ref[...]
    out_ref[...] = logits.astype(out_ref.dtype)


def _pick_block_b(batch, l_pad, s_pad, e, nkp, vp):
    b8 = _round_up(batch, SUB)
    # Fill the MXU M dimension (256 rows on v6e/v7x) per grid step.
    blk = _round_up(max(1, 256 // max(l_pad, 1)), SUB)
    # Conservative per-batch-row bytes of in-kernel intermediates (one-hot bf16,
    # x bf16 x2 for shifted copies, acc/y f32) -> cap against a VMEM budget that is
    # safe for v7x's smaller VMEM.
    per_row = s_pad * vp * 2 + 2 * s_pad * e * 2 + 2 * l_pad * nkp * 4 + 2 * nkp * 4
    vmem_budget = 20 << 20
    blk = min(blk, max(SUB, (vmem_budget // per_row) // SUB * SUB))
    # Keep >= 2 grid steps when batch allows it (v7x dual-TC sharding of the batch axis).
    if b8 >= 2 * SUB:
        blk = min(blk, max(SUB, (b8 // 2) // SUB * SUB))
    return min(blk, b8)


def make_textcnn_forward(params, kernel_sizes, seq_len, *, block_b=None):
    """Packs weights ONCE (hoisted out of the per-call path) and returns a jitted
    forward: text[int32, B x seq_len] -> logits[f32, B x class_num]."""
    kernel_sizes = tuple(int(k) for k in kernel_sizes)
    n = len(kernel_sizes)
    ks_max, ks_min = max(kernel_sizes), min(kernel_sizes)

    V, E = params["embed"].shape
    K = params["conv0_w"].shape[0]
    C = params["fc_b"].shape[-1]
    S = int(seq_len)
    assert S >= ks_max, "sequence shorter than largest conv kernel"

    NK = n * K
    NKp = _round_up(max(NK, LANE), LANE)        # lane-dense conv-feature width
    Cp = _round_up(max(C, LANE), LANE)          # lane-dense logits width
    Vp = _round_up(max(V, LANE), LANE)          # lane-dense vocab (one-hot gather)

    L = S - ks_min + 1
    L_pad = _round_up(L, SUB)
    S_pad = _round_up(L_pad + ks_max - 1, SUB)  # sublane-aligned -> no tile-crossing reshapes

    # --- packed (cached) operands -------------------------------------------------
    embed_p = (jnp.zeros((Vp, E), jnp.float32).at[:V].set(params["embed"])
               .astype(jnp.bfloat16))

    # Fused conv weight [ks_max*E, NKp]: tap s lives in rows s*E:(s+1)*E; kernel g's
    # output channels in columns g*K:(g+1)*K; everything else zero (inert).
    w_cat = jnp.zeros((ks_max * E, NKp), jnp.float32)
    bias_mask = jnp.zeros((L_pad, NKp), jnp.float32)
    pos = jnp.arange(L_pad)[:, None]
    for g, ks in enumerate(kernel_sizes):
        wg = jnp.transpose(params[f"conv{g}_w"][:, 0], (1, 2, 0)).reshape(ks * E, K)
        w_cat = w_cat.at[:ks * E, g * K:(g + 1) * K].set(wg)
        valid = (pos <= (S - ks)).astype(jnp.float32)                    # [L_pad, 1]
        bg = params[f"conv{g}_b"][None, :]                               # [1, K]
        bias_mask = bias_mask.at[:, g * K:(g + 1) * K].set(
            valid * bg + (1.0 - valid) * (-1e30))
    w_cat = w_cat.astype(jnp.bfloat16)

    # FC stays f32 (epilogue precision); padded rows/cols are zero -> inert.
    wfc = jnp.zeros((NKp, Cp), jnp.float32).at[:NK, :C].set(params["fc_w"].T)
    bfc = jnp.zeros((1, Cp), jnp.float32).at[0, :C].set(params["fc_b"])

    kernel = functools.partial(_textcnn_kernel, ks_max, L_pad, S_pad)

    @jax.jit
    def forward(text):
        B, S_in = text.shape
        assert S_in == S, "forward built for a fixed sequence length"
        blk = block_b if block_b is not None else _pick_block_b(B, L_pad, S_pad, E, NKp, Vp)
        B_pad = _round_up(max(B, blk), blk)
        grid = (B_pad // blk,)

        text_pad = jnp.pad(text.astype(jnp.int32),
                           ((0, B_pad - B), (0, S_pad - S)))             # pad token = 0
        text_flat = text_pad.reshape(B_pad * S_pad, 1)

        out = pl.pallas_call(
            kernel,
            out_shape=jax.ShapeDtypeStruct((B_pad, Cp), jnp.float32),
            grid_spec=pltpu.PrefetchScalarGridSpec(
                num_scalar_prefetch=0,
                grid=grid,
                in_specs=[
                    pl.BlockSpec((blk * S_pad, 1), lambda i: (i, 0)),    # token ids
                    pl.BlockSpec((Vp, E), lambda i: (0, 0)),             # embed table (bf16)
                    pl.BlockSpec((ks_max * E, NKp), lambda i: (0, 0)),   # fused conv weight
                    pl.BlockSpec((L_pad, NKp), lambda i: (0, 0)),        # bias + validity mask
                    pl.BlockSpec((NKp, Cp), lambda i: (0, 0)),           # fc weight (f32)
                    pl.BlockSpec((1, Cp), lambda i: (0, 0)),             # fc bias
                ],
                out_specs=pl.BlockSpec((blk, Cp), lambda i: (i, 0)),
            ),
            compiler_params=pltpu.CompilerParams(
                dimension_semantics=("parallel",),
                vmem_limit_bytes=32 * 1024 * 1024),
        )(text_flat, embed_p, w_cat, bias_mask, wfc, bfc)

        # TODO(synk): dropout acts as identity here (inference); training-mode stochastic
        # dropout is not reproduced.
        return out[:B, :C]

    return forward


def textcnn_reference(text, params, kernel_sizes):
    """Pure-JAX f32 reference following the PyTorch NCHW conv path."""
    x = params["embed"][text][:, None, :, :]                             # [B, 1, S, E]
    feats = []
    for i, _ in enumerate(kernel_sizes):
        w = params[f"conv{i}_w"]                                         # [K, 1, ks, E]
        b = params[f"conv{i}_b"]
        y = jax.lax.conv_general_dilated(
            x, w, window_strides=(1, 1), padding="VALID",
            dimension_numbers=("NCHW", "OIHW", "NCHW"))                  # [B, K, L, 1]
        y = jnp.maximum(y + b[None, :, None, None], 0.0)[:, :, :, 0]
        feats.append(jnp.max(y, axis=2))                                 # [B, K]
    feat = jnp.concatenate(feats, axis=1)
    return feat @ params["fc_w"].T + params["fc_b"]


def init_params(key, vocab_num, embed_dim, kernel_num, kernel_sizes, class_num):
    keys = jax.random.split(key, 3 + 2 * len(kernel_sizes))
    params = {
        "embed": 0.1 * jax.random.normal(keys[0], (vocab_num, embed_dim), jnp.float32),
        "fc_w": 0.1 * jax.random.normal(
            keys[1], (class_num, len(kernel_sizes) * kernel_num), jnp.float32),
        "fc_b": 0.1 * jax.random.normal(keys[2], (class_num,), jnp.float32),
    }
    for i, ks in enumerate(kernel_sizes):
        params[f"conv{i}_w"] = 0.1 * jax.random.normal(
            keys[3 + 2 * i], (kernel_num, 1, ks, embed_dim), jnp.float32)
        params[f"conv{i}_b"] = 0.1 * jax.random.normal(
            keys[4 + 2 * i], (kernel_num,), jnp.float32)
    return params


if __name__ == "__main__":
    # Small config consistent with the module's __init__.
    vocab_num, embed_dim, class_num = 50, 32, 4
    kernel_num, kernel_sizes = 8, (3, 4, 5)
    batch, seq_len = 2, 16

    root = jax.random.PRNGKey(0)
    k_param, k_text = jax.random.split(root)
    params = init_params(k_param, vocab_num, embed_dim, kernel_num,
                         kernel_sizes, class_num)
    text = jax.random.randint(k_text, (batch, seq_len), 0, vocab_num, jnp.int32)

    forward = make_textcnn_forward(params, kernel_sizes, seq_len)
    logits = forward(text)
    logits = jax.block_until_ready(logits)

    ref = textcnn_reference(text, params, kernel_sizes)
    assert logits.shape == (batch, class_num)
    # bf16 embed/conv MXU operands with f32 accumulation (FC kept f32) ->
    # compare against the f32 reference loosely. Intentional precision choice.
    assert jnp.allclose(logits, ref, atol=2e-2, rtol=2e-2), (logits, ref)

    print("KERNEL_OK")
</pallas_src>

<mosaic_0001>
module attributes {stable_mosaic.version = 11 : i64} {
  func.func @_textcnn_kernel(%arg0: i32, %arg1: memref<192x1xi32, #tpu.memory_space<vmem>>, %arg2: memref<128x32xbf16, #tpu.memory_space<vmem>>, %arg3: memref<160x128xbf16, #tpu.memory_space<vmem>>, %arg4: memref<16x128xf32, #tpu.memory_space<vmem>>, %arg5: memref<128x128xf32, #tpu.memory_space<vmem>>, %arg6: memref<1x128xf32, #tpu.memory_space<vmem>>, %arg7: memref<8x128xf32, #tpu.memory_space<vmem>>) attributes {dimension_semantics = [#tpu.dimension_semantics<parallel>], iteration_bounds = array<i64: 1>, scalar_prefetch = 0 : i64, scratch_operands = 0 : i64, tpu.core_type = #tpu.core_type<tc>, window_params = [{transform_indices = @transform_0, window_bounds = array<i64: 192, 1>}, {pipeline_mode = #tpu.pipeline_mode<synchronous>, transform_indices = @transform_1, window_bounds = array<i64: 128, 32>}, {pipeline_mode = #tpu.pipeline_mode<synchronous>, transform_indices = @transform_2, window_bounds = array<i64: 160, 128>}, {pipeline_mode = #tpu.pipeline_mode<synchronous>, transform_indices = @transform_3, window_bounds = array<i64: 16, 128>}, {pipeline_mode = #tpu.pipeline_mode<synchronous>, transform_indices = @transform_4, window_bounds = array<i64: 128, 128>}, {pipeline_mode = #tpu.pipeline_mode<synchronous>, transform_indices = @transform_5, window_bounds = array<i64: 1, 128>}, {transform_indices = @transform_6, window_bounds = array<i64: 8, 128>}]} {
    %c0 = arith.constant 0 : index
    %c0_0 = arith.constant 0 : index
    %0 = vector.load %arg1[%c0, %c0_0] : memref<192x1xi32, #tpu.memory_space<vmem>>, vector<192x1xi32>
    %1 = tpu.iota {dimensions = array<i32: 1>} : vector<192x128xi32>
    %2 = vector.broadcast %0 : vector<192x1xi32> to vector<192x128xi32>
    %3 = arith.cmpi eq, %2, %1 : vector<192x128xi32>
    %4 = arith.extui %3 : vector<192x128xi1> to vector<192x128xi32>
    %5 = arith.sitofp %4 : vector<192x128xi32> to vector<192x128xf32>
    %6 = arith.truncf %5 : vector<192x128xf32> to vector<192x128xbf16>
    %c0_1 = arith.constant 0 : index
    %c0_2 = arith.constant 0 : index
    %7 = vector.load %arg2[%c0_1, %c0_2] : memref<128x32xbf16, #tpu.memory_space<vmem>>, vector<128x32xbf16>
    %cst = arith.constant dense<0.000000e+00> : vector<192x32xf32>
    %8 = tpu.matmul %6, %7, %cst {dimension_numbers = #tpu.dot_dimension_numbers<[1], [0], [0], [1], [0, 0, 1, 1], [], []>} : vector<192x128xbf16>, vector<128x32xbf16>, vector<192x32xf32> -> vector<192x32xf32>
    %9 = arith.truncf %8 : vector<192x32xf32> to vector<192x32xbf16>
    %10 = vector.shape_cast %9 : vector<192x32xbf16> to vector<8x24x32xbf16>
    %c0_3 = arith.constant 0 : index
    %c0_4 = arith.constant 0 : index
    %11 = vector.load %arg3[%c0_3, %c0_4] : memref<160x128xbf16, #tpu.memory_space<vmem>>, vector<160x128xbf16>
    %cst_5 = arith.constant 0.000000e+00 : f32
    %12 = vector.broadcast %cst_5 : f32 to vector<128x128xf32>
    %13 = vector.extract_strided_slice %10 {offsets = [0, 0, 0], sizes = [8, 16, 32], strides = [1, 1, 1]} : vector<8x24x32xbf16> to vector<8x16x32xbf16>
    %14 = vector.shape_cast %13 : vector<8x16x32xbf16> to vector<128x32xbf16>
    %15 = vector.extract_strided_slice %11 {offsets = [0, 0], sizes = [32, 128], strides = [1, 1]} : vector<160x128xbf16> to vector<32x128xbf16>
    %cst_6 = arith.constant dense<0.000000e+00> : vector<128x128xf32>
    %16 = tpu.matmul %14, %15, %cst_6 {dimension_numbers = #tpu.dot_dimension_numbers<[1], [0], [0], [1], [0, 0, 1, 1], [], []>} : vector<128x32xbf16>, vector<32x128xbf16>, vector<128x128xf32> -> vector<128x128xf32>
    %17 = arith.addf %12, %16 : vector<128x128xf32>
    %18 = vector.extract_strided_slice %10 {offsets = [0, 1, 0], sizes = [8, 16, 32], strides = [1, 1, 1]} : vector<8x24x32xbf16> to vector<8x16x32xbf16>
    %19 = vector.shape_cast %18 : vector<8x16x32xbf16> to vector<128x32xbf16>
    %20 = vector.extract_strided_slice %11 {offsets = [32, 0], sizes = [32, 128], strides = [1, 1]} : vector<160x128xbf16> to vector<32x128xbf16>
    %cst_7 = arith.constant dense<0.000000e+00> : vector<128x128xf32>
    %21 = tpu.matmul %19, %20, %cst_7 {dimension_numbers = #tpu.dot_dimension_numbers<[1], [0], [0], [1], [0, 0, 1, 1], [], []>} : vector<128x32xbf16>, vector<32x128xbf16>, vector<128x128xf32> -> vector<128x128xf32>
    %22 = arith.addf %17, %21 : vector<128x128xf32>
    %23 = vector.extract_strided_slice %10 {offsets = [0, 2, 0], sizes = [8, 16, 32], strides = [1, 1, 1]} : vector<8x24x32xbf16> to vector<8x16x32xbf16>
    %24 = vector.shape_cast %23 : vector<8x16x32xbf16> to vector<128x32xbf16>
    %25 = vector.extract_strided_slice %11 {offsets = [64, 0], sizes = [32, 128], strides = [1, 1]} : vector<160x128xbf16> to vector<32x128xbf16>
    %cst_8 = arith.constant dense<0.000000e+00> : vector<128x128xf32>
    %26 = tpu.matmul %24, %25, %cst_8 {dimension_numbers = #tpu.dot_dimension_numbers<[1], [0], [0], [1], [0, 0, 1, 1], [], []>} : vector<128x32xbf16>, vector<32x128xbf16>, vector<128x128xf32> -> vector<128x128xf32>
    %27 = arith.addf %22, %26 : vector<128x128xf32>
    %28 = vector.extract_strided_slice %10 {offsets = [0, 3, 0], sizes = [8, 16, 32], strides = [1, 1, 1]} : vector<8x24x32xbf16> to vector<8x16x32xbf16>
    %29 = vector.shape_cast %28 : vector<8x16x32xbf16> to vector<128x32xbf16>
    %30 = vector.extract_strided_slice %11 {offsets = [96, 0], sizes = [32, 128], strides = [1, 1]} : vector<160x128xbf16> to vector<32x128xbf16>
    %cst_9 = arith.constant dense<0.000000e+00> : vector<128x128xf32>
    %31 = tpu.matmul %29, %30, %cst_9 {dimension_numbers = #tpu.dot_dimension_numbers<[1], [0], [0], [1], [0, 0, 1, 1], [], []>} : vector<128x32xbf16>, vector<32x128xbf16>, vector<128x128xf32> -> vector<128x128xf32>
    %32 = arith.addf %27, %31 : vector<128x128xf32>
    %33 = vector.extract_strided_slice %10 {offsets = [0, 4, 0], sizes = [8, 16, 32], strides = [1, 1, 1]} : vector<8x24x32xbf16> to vector<8x16x32xbf16>
    %34 = vector.shape_cast %33 : vector<8x16x32xbf16> to vector<128x32xbf16>
    %35 = vector.extract_strided_slice %11 {offsets = [128, 0], sizes = [32, 128], strides = [1, 1]} : vector<160x128xbf16> to vector<32x128xbf16>
    %cst_10 = arith.constant dense<0.000000e+00> : vector<128x128xf32>
    %36 = tpu.matmul %34, %35, %cst_10 {dimension_numbers = #tpu.dot_dimension_numbers<[1], [0], [0], [1], [0, 0, 1, 1], [], []>} : vector<128x32xbf16>, vector<32x128xbf16>, vector<128x128xf32> -> vector<128x128xf32>
    %37 = arith.addf %32, %36 : vector<128x128xf32>
    %38 = vector.shape_cast %37 : vector<128x128xf32> to vector<8x16x128xf32>
    %c0_11 = arith.constant 0 : index
    %c0_12 = arith.constant 0 : index
    %39 = vector.load %arg4[%c0_11, %c0_12] : memref<16x128xf32, #tpu.memory_space<vmem>>, vector<16x128xf32>
    %40 = vector.shape_cast %39 : vector<16x128xf32> to vector<1x16x128xf32>
    %41 = vector.broadcast %40 : vector<1x16x128xf32> to vector<8x16x128xf32>
    %42 = arith.addf %38, %41 : vector<8x16x128xf32>
    %cst_13 = arith.constant 0.000000e+00 : f32
    %43 = vector.broadcast %cst_13 : f32 to vector<8x16x128xf32>
    %44 = arith.maximumf %42, %43 : vector<8x16x128xf32>
    %cst_14 = arith.constant dense<0xFF800000> : vector<8x128xf32>
    %45 = vector.multi_reduction <maximumf>, %44, %cst_14 [1] : vector<8x16x128xf32> to vector<8x128xf32>
    %c0_15 = arith.constant 0 : index
    %c0_16 = arith.constant 0 : index
    %46 = vector.load %arg5[%c0_15, %c0_16] : memref<128x128xf32, #tpu.memory_space<vmem>>, vector<128x128xf32>
    %cst_17 = arith.constant dense<0.000000e+00> : vector<8x128xf32>
    %47 = tpu.matmul %45, %46, %cst_17 {dimension_numbers = #tpu.dot_dimension_numbers<[1], [0], [0], [1], [0, 0, 1, 1], [], []>} : vector<8x128xf32>, vector<128x128xf32>, vector<8x128xf32> -> vector<8x128xf32>
    %c0_18 = arith.constant 0 : index
    %c0_19 = arith.constant 0 : index
    %48 = vector.load %arg6[%c0_18, %c0_19] : memref<1x128xf32, #tpu.memory_space<vmem>>, vector<1x128xf32>
    %49 = vector.broadcast %48 : vector<1x128xf32> to vector<8x128xf32>
    %50 = arith.addf %47, %49 : vector<8x128xf32>
    %c0_20 = arith.constant 0 : index
    %c0_21 = arith.constant 0 : index
    %51 = vector.load %arg7[%c0_20, %c0_21] : memref<8x128xf32, #tpu.memory_space<vmem>>, vector<8x128xf32>
    tpu.vector_store %arg7[%c0_20, %c0_21], %50 {strides = array<i32>} : memref<8x128xf32, #tpu.memory_space<vmem>>, vector<8x128xf32>,
    return
  }
  func.func @transform_0(%arg0: i32) -> (i32, i32) {
    %c0_i32 = arith.constant 0 : i32
    %c0_i32_0 = arith.constant 0 : i32
    return %arg0, %c0_i32 : i32, i32
  }
  func.func @transform_1(%arg0: i32) -> (i32, i32) {
    %c0_i32 = arith.constant 0 : i32
    %c0_i32_0 = arith.constant 0 : i32
    %c0_i32_1 = arith.constant 0 : i32
    return %c0_i32, %c0_i32_0 : i32, i32
  }
  func.func @transform_2(%arg0: i32) -> (i32, i32) {
    %c0_i32 = arith.constant 0 : i32
    %c0_i32_0 = arith.constant 0 : i32
    %c0_i32_1 = arith.constant 0 : i32
    return %c0_i32, %c0_i32_0 : i32, i32
  }
  func.func @transform_3(%arg0: i32) -> (i32, i32) {
    %c0_i32 = arith.constant 0 : i32
    %c0_i32_0 = arith.constant 0 : i32
    %c0_i32_1 = arith.constant 0 : i32
    return %c0_i32, %c0_i32_0 : i32, i32
  }
  func.func @transform_4(%arg0: i32) -> (i32, i32) {
    %c0_i32 = arith.constant 0 : i32
    %c0_i32_0 = arith.constant 0 : i32
    %c0_i32_1 = arith.constant 0 : i32
    return %c0_i32, %c0_i32_0 : i32, i32
  }
  func.func @transform_5(%arg0: i32) -> (i32, i32) {
    %c0_i32 = arith.constant 0 : i32
    %c0_i32_0 = arith.constant 0 : i32
    %c0_i32_1 = arith.constant 0 : i32
    return %c0_i32, %c0_i32_0 : i32, i32
  }
  func.func @transform_6(%arg0: i32) -> (i32, i32) {
    %c0_i32 = arith.constant 0 : i32
    %c0_i32_0 = arith.constant 0 : i32
    return %arg0, %c0_i32 : i32, i32
  }
}

</mosaic_0001>

<bundles_post_ra>
// kernel: forward.1
= control target key start
LH: loop header
LB: loop body
LE: loop exit
PB: predicated region body
PF: predicated region fallthrough
CT: control target
= control target key end

     0   :  { %11 = vsyncpa [#allocation3], 0  ;;  %s3793_s0 = inlined_call_operand.vmem [shape: s32[192,1], index: 0, kind: input, shape index: {}]   ;;  %s3794_s1 = inlined_call_operand.hbm [shape: bf16[128,32], index: 1, kind: input, shape index: {}]   ;;  %s3795_s2 = inlined_call_operand.vmem [shape: bf16[160,128], index: 2, kind: input, shape index: {}]   ;;  %s3796_s3 = inlined_call_operand.hbm [shape: f32[16,128], index: 3, kind: input, shape index: {}]   ;;  %s3797_s4 = inlined_call_operand.vmem [shape: f32[128,128], index: 4, kind: input, shape index: {}]   ;;  %s3798_s5 = inlined_call_operand.vmem [shape: f32[1,128], index: 5, kind: input, shape index: {}]   ;;  %s3799_s6 = inlined_call_operand.vmem [shape: f32[8,128], index: 6, kind: output, shape index: {}]  }
   0x1   :  { %12 = vsyncpa [#allocation5], 0  ;;  %s2529_s21 = smov [#allocation2]  }
   0x2   :  { %s20_s22 = sshll.u32 %s2529_s21, 4  ;;  %s21_s22 = int_to_ptr.vmem [resolvable:$true] %s20_s22 }
   0x3   :  { %s2493_s23 = scalar_lea.vmem %s21_s22, 1024  ;;  %p2498_p1 = scmp.lt.s32.totalorder %s21_s22, %s21_s22 }
   0x4   :  { %p2494_p0 = scmp.ne.s32.totalorder %s21_s22, %s2493_s23  ;;  %p2499_p2 = scmp.lt.s32.totalorder %s2493_s23, %s2493_s23 }
   0x6   :  { %p2500_p3 = por %p2499_p2, %p2498_p1 }
   0x8   :  { %p2501_p4 = pnand %p2500_p3, %p2494_p0 }
   0xa   :  { %2504 = shalt.err (!%p2501_p4)
}
   0xb   :  { %s2530_s24 = smov 64   ;;  %s2531_s25 = smov 4  }
   0xc   :  { %26 = dma.hbm_to_vmem [thread:$0]  %s3794_s1, 1024, %s21_s22, [#allocation3], %s2530_s24, %s2530_s24, %s2531_s25  }
   0xd   :  { %s2532_s28 = smov [#allocation4]  }
   0xe   :  { %s34_s29 = sshll.u32 %s2532_s28, 4  ;;  %s35_s29 = int_to_ptr.vmem [resolvable:$true] %s34_s29 }
   0xf   :  { %s2513_s30 = scalar_lea.vmem %s35_s29, 256  ;;  %p2518_p6 = scmp.lt.s32.totalorder %s35_s29, %s35_s29 }
  0x10   :  { %p2514_p5 = scmp.ne.s32.totalorder %s35_s29, %s2513_s30  ;;  %p2519_p7 = scmp.lt.s32.totalorder %s2513_s30, %s2513_s30 }
  0x12   :  { %p2520_p8 = por %p2519_p7, %p2518_p6 }
  0x14   :  { %p2521_p9 = pnand %p2520_p8, %p2514_p5 }
  0x16   :  { %2524 = shalt.err (!%p2521_p9)
}
  0x17   :  { %s2533_s7 = smov 128   ;;  %s2534_s8 = smov 8  }
  0x18   :  { %40 = dma.hbm_to_vmem [thread:$0]  %s3796_s3, 256, %s35_s29, [#allocation5], %s2533_s7, %s2533_s7, %s2534_s8  }
  0x19   :  { %2525 = dma.done.wait [#allocation3], 1024  }
  0x1a   :  { %2526 = vsyncadd [#allocation3], 4294966272 }
  0x1b   :  { %2527 = dma.done.wait [#allocation5], 256  }
  0x1c   :  { %2528 = vsyncadd [#allocation5], 4294967040  ;;  %v2535_v0 = vmov 0   ;;  %v54_v1 = vld [vmem:[%s3793_s0 + $0x10] sm:$0xff]  ;;  %v52_v2 = vld [vmem:[%s3793_s0] sm:$0xff]  ;;  %v76_v33 = vlaneseq }
  0x1d   :  { %2466 = vset.pattern.permute.xlu1 %v2535_v0  ;;  %2465 = vset.pattern.permute.xlu0 %v2535_v0  ;;  %v55_v3 = vld [vmem:[%s3793_s0 + $0x18] sm:$0xff]  ;;  %v53_v4 = vld [vmem:[%s3793_s0 + $0x8] sm:$0xff]  ;;  %v56_v6 = vld [vmem:[%s3793_s0 + $0x20] sm:$0xff]  ;;  %v2536_v39 = vmov 1.0|1.0  }
  0x1e   :  { %85 = vperm.xlu1 %2466, %v54_v1   ;;  %79 = vperm.xlu0 %2465, %v52_v2   ;;  %v57_v5 = vld [vmem:[%s3793_s0 + $0x28] sm:$0xff]  ;;  %v59_v7 = vld [vmem:[%s3793_s0 + $0x38] sm:$0xff]  ;;  %v2468_v9 = vld [vmem:[#allocation2 + $0x30] sm:$0xff]   ;;  %v2652_v36 = vand.u32 127, %v76_v33 }
  0x1f   :  { %v2467_v8 = vld [vmem:[#allocation2 + $0x38] sm:$0xff]   ;;  %v58_v10 = vld [vmem:[%s3793_s0 + $0x30] sm:$0xff]  ;;  %v2469_v11 = vld [vmem:[#allocation2 + $0x28] sm:$0xff]  }
  0x20   :  { %2276 = vmatprep.subr.bf16.mxu0 %v2467_v8  ;;  %v61_v12 = vld [vmem:[%s3793_s0 + $0x48] sm:$0xff]  ;;  %v60_v13 = vld [vmem:[%s3793_s0 + $0x40] sm:$0xff]  ;;  %v63_v15 = vld [vmem:[%s3793_s0 + $0x58] sm:$0xff] }
  0x21   :  { %2277 = vmatpush3.bf16.msra.mxu0 %v2467_v8  ;;  %v2470_v14 = vld [vmem:[#allocation2 + $0x20] sm:$0xff]   ;;  %v62_v16 = vld [vmem:[%s3793_s0 + $0x50] sm:$0xff]  ;;  %v2471_v17 = vld [vmem:[#allocation2 + $0x18] sm:$0xff]  }
  0x22   :  { %88 = vperm.xlu1 %2466, %v55_v3   ;;  %82 = vperm.xlu0 %2465, %v53_v4   ;;  %v65_v18 = vld [vmem:[%s3793_s0 + $0x68] sm:$0xff]  ;;  %v64_v19 = vld [vmem:[%s3793_s0 + $0x60] sm:$0xff]  ;;  %v2472_v20 = vld [vmem:[#allocation2 + $0x10] sm:$0xff]  }
  0x23   :  { %2278 = vmatprep.subr.bf16.mxu0 %v2468_v9  ;;  %v67_v21 = vld [vmem:[%s3793_s0 + $0x78] sm:$0xff]  ;;  %v66_v22 = vld [vmem:[%s3793_s0 + $0x70] sm:$0xff]  ;;  %v2473_v23 = vld [vmem:[#allocation2 + $0x8] sm:$0xff]  }
  0x24   :  { %v69_v24 = vld [vmem:[%s3793_s0 + $0x88] sm:$0xff]  ;;  %v68_v25 = vld [vmem:[%s3793_s0 + $0x80] sm:$0xff]  ;;  %v71_v27 = vld [vmem:[%s3793_s0 + $0x98] sm:$0xff] }
  0x25   :  { %2279 = vmatpush3.bf16.msra.mxu0 %v2468_v9  ;;  %v2474_v26 = vld [vmem:[#allocation2] sm:$0xff]   ;;  %v70_v28 = vld [vmem:[%s3793_s0 + $0x90] sm:$0xff]  ;;  %v73_v29 = vld [vmem:[%s3793_s0 + $0xa8] sm:$0xff] }
  0x26   :  { %94 = vperm.xlu1 %2466, %v57_v5   ;;  %91 = vperm.xlu0 %2465, %v56_v6   ;;  %v72_v30 = vld [vmem:[%s3793_s0 + $0xa0] sm:$0xff]  ;;  %v75_v31 = vld [vmem:[%s3793_s0 + $0xb8] sm:$0xff]  ;;  %v74_v32 = vld [vmem:[%s3793_s0 + $0xb0] sm:$0xff] }
  0x27   :  { %2280 = vmatprep.subr.bf16.mxu0 %v2469_v11  ;;  %v2475_v60 = vld [vmem:[%s3795_s2 + $0x18] sm:$0xff]   ;;  %v2476_v61 = vld [vmem:[%s3795_s2 + $0x10] sm:$0xff]   ;;  %v2693_v63 = vld [vmem:[%s3795_s2 + $0x8] sm:$0xff]  }
  0x28   :  { %2451 = vmatprep.subr.bf16.mxu1 %v2475_v60  ;;  %v2687_v62 = vld [vmem:[%s3795_s2 + $0x38] sm:$0xff]  }
  0x29   :  { %2281 = vmatpush3.bf16.msra.mxu0 %v2469_v11  ;;  %2453 = vmatpush3.bf16.msra.mxu1 %v2475_v60 }
  0x2a   :  { %100 = vperm.xlu1 %2466, %v59_v7   ;;  %97 = vperm.xlu0 %2465, %v58_v10  }
  0x2b   :  { %2282 = vmatprep.subr.bf16.mxu0 %v2470_v14  ;;  %2452 = vmatprep.subr.bf16.mxu1 %v2476_v61 }
  0x2d   :  { %2283 = vmatpush3.bf16.msra.mxu0 %v2470_v14  ;;  %2454 = vmatpush3.bf16.msra.mxu1 %v2476_v61 }
  0x2e   :  { %106 = vperm.xlu1 %2466, %v61_v12   ;;  %103 = vperm.xlu0 %2465, %v60_v13  }
  0x2f   :  { %2284 = vmatprep.subr.bf16.mxu0 %v2471_v17  ;;  %2336 = vmatprep.subr.bf16.mxu1 %v2693_v63 }
  0x31   :  { %2285 = vmatpush3.bf16.msra.mxu0 %v2471_v17 }
  0x32   :  { %112 = vperm.xlu1 %2466, %v63_v15   ;;  %109 = vperm.xlu0 %2465, %v62_v16  }
  0x33   :  { %2286 = vmatprep.subr.bf16.mxu0 %v2472_v20 }
  0x35   :  { %2287 = vmatpush3.bf16.msra.mxu0 %v2472_v20 }
  0x36   :  { %118 = vperm.xlu1 %2466, %v65_v18   ;;  %115 = vperm.xlu0 %2465, %v64_v19  }
  0x37   :  { %2288 = vmatprep.subr.bf16.mxu0 %v2473_v23 }
  0x39   :  { %2289 = vmatpush3.bf16.msra.mxu0 %v2473_v23 }
  0x3a   :  { %124 = vperm.xlu1 %2466, %v67_v21   ;;  %121 = vperm.xlu0 %2465, %v66_v22  }
  0x3b   :  { %2290 = vmatprep.subr.bf16.mxu0 %v2474_v26 }
  0x3d   :  { %2291 = vmatpush3.bf16.msra.mxu0 %v2474_v26 }
  0x3e   :  { %130 = vperm.xlu1 %2466, %v69_v24   ;;  %127 = vperm.xlu0 %2465, %v68_v25  }
  0x3f   :  { %2316 = vmatprep.subr.bf16.mxu0 %v2475_v60 }
  0x42   :  { %136 = vperm.xlu1 %2466, %v71_v27   ;;  %133 = vperm.xlu0 %2465, %v70_v28  }
  0x46   :  { %142 = vperm.xlu1 %2466, %v73_v29   ;;  %139 = vperm.xlu0 %2465, %v72_v30  }
  0x4a   :  { %148 = vperm.xlu1 %2466, %v75_v31   ;;  %145 = vperm.xlu0 %2465, %v74_v32  }
  0x99   :  { %v86_v34 = vpop.permute.xlu1 %85  ;;  %v80_v35 = vpop.permute.xlu0 %79 }
  0x9a   :  { %vm152_vm0 = vcmp.eq.s32.totalorder %v86_v34, %v2652_v36  ;;  %vm150_vm3 = vcmp.eq.s32.totalorder %v80_v35, %v2652_v36 }
  0x9d   :  { %v89_v37 = vpop.permute.xlu1 %88  ;;  %v83_v38 = vpop.permute.xlu0 %82 }
  0x9e   :  { %vm153_vm1 = vcmp.eq.s32.totalorder %v89_v37, %v2652_v36  ;;  %vm151_vm2 = vcmp.eq.s32.totalorder %v83_v38, %v2652_v36 }
  0x9f   :  { %vm2020_vm4 = vmpackc.low %vm153_vm1, %vm152_vm0 }
  0xa0   :  { %vm2018_vm5 = vmpackc.low %vm151_vm2, %vm150_vm3 }
  0xa1   :  { %2292 = vmatprep.mubr.msk.bf16.mxu0 %vm2018_vm5, %v2536_v39  ;;  %v95_v40 = vpop.permute.xlu1 %94  ;;  %v92_v41 = vpop.permute.xlu0 %91 }
  0xa2   :  { %vm155_vm6 = vcmp.eq.s32.totalorder %v95_v40, %v2652_v36  ;;  %2293 = vmatmul.mubr.msk.bf16.vlgmr.msra.gmra.mxu0 %vm2020_vm4, %v2536_v39  ;;  %vm154_vm7 = vcmp.eq.s32.totalorder %v92_v41, %v2652_v36 }
  0xa3   :  { %vm2022_vm8 = vmpackc.low %vm155_vm6, %vm154_vm7  ;;  %2317 = vmatpush3.bf16.msra.mxu0 %v2475_v60 }
  0xa4   :  { %2296 = vmatprep.mubr.msk.bf16.mxu0 %vm2022_vm8, %v2536_v39  ;;  %2318 = vmatprep.subr.bf16.mxu0 %v2476_v61 }
  0xa5   :  { %v101_v42 = vpop.permute.xlu1 %100  ;;  %v98_v43 = vpop.permute.xlu0 %97 }
  0xa6   :  { %vm157_vm9 = vcmp.eq.s32.totalorder %v101_v42, %v2652_v36  ;;  %vm156_vm10 = vcmp.eq.s32.totalorder %v98_v43, %v2652_v36 }
  0xa7   :  { %vm2024_vm11 = vmpackc.low %vm157_vm9, %vm156_vm10  ;;  %2319 = vmatpush3.bf16.msra.mxu0 %v2476_v61 }
  0xa8   :  { %2376 = vmatprep.subr.bf16.mxu0 %v2687_v62 }
  0xa9   :  { %v107_v44 = vpop.permute.xlu1 %106  ;;  %v104_v45 = vpop.permute.xlu0 %103 }
  0xaa   :  { %vm159_vm12 = vcmp.eq.s32.totalorder %v107_v44, %v2652_v36  ;;  %2297 = vmatmul.mubr.msk.bf16.gmra.mxu0 %vm2024_vm11, %v2536_v39  ;;  %vm158_vm13 = vcmp.eq.s32.totalorder %v104_v45, %v2652_v36 }
  0xab   :  { %vm2026_vm14 = vmpackc.low %vm159_vm12, %vm158_vm13 }
  0xac   :  { %2300 = vmatprep.mubr.msk.bf16.mxu0 %vm2026_vm14, %v2536_v39 }
  0xad   :  { %v113_v46 = vpop.permute.xlu1 %112  ;;  %v110_v47 = vpop.permute.xlu0 %109 }
  0xae   :  { %vm161_vm15 = vcmp.eq.s32.totalorder %v113_v46, %v2652_v36  ;;  %vm160_vm0 = vcmp.eq.s32.totalorder %v110_v47, %v2652_v36 }
  0xaf   :  { %vm2028_vm1 = vmpackc.low %vm161_vm15, %vm160_vm0 }
  0xb1   :  { %v119_v48 = vpop.permute.xlu1 %118  ;;  %v116_v49 = vpop.permute.xlu0 %115 }
  0xb2   :  { %vm163_vm2 = vcmp.eq.s32.totalorder %v119_v48, %v2652_v36  ;;  %2301 = vmatmul.mubr.msk.bf16.gmra.mxu0 %vm2028_vm1, %v2536_v39  ;;  %vm162_vm3 = vcmp.eq.s32.totalorder %v116_v49, %v2652_v36 }
  0xb3   :  { %vm2030_vm4 = vmpackc.low %vm163_vm2, %vm162_vm3 }
  0xb4   :  { %2304 = vmatprep.mubr.msk.bf16.mxu0 %vm2030_vm4, %v2536_v39  ;;  %vm1013_vm4 = vcmask 1042432  }
  0xb5   :  { %v125_v50 = vpop.permute.xlu1 %124  ;;  %v122_v51 = vpop.permute.xlu0 %121 }
  0xb6   :  { %vm165_vm5 = vcmp.eq.s32.totalorder %v125_v50, %v2652_v36  ;;  %vm164_vm6 = vcmp.eq.s32.totalorder %v122_v51, %v2652_v36 }
  0xb7   :  { %vm2032_vm7 = vmpackc.low %vm165_vm5, %vm164_vm6  ;;  %vm1014_vm5 = vcmask 1046532   ;;  %vm1541_vm6 = vcmask 1041408  }
  0xb9   :  { %v131_v52 = vpop.permute.xlu1 %130  ;;  %v128_v53 = vpop.permute.xlu0 %127 }
  0xba   :  { %vm167_vm8 = vcmp.eq.s32.totalorder %v131_v52, %v2652_v36  ;;  %2305 = vmatmul.mubr.msk.bf16.gmra.mxu0 %vm2032_vm7, %v2536_v39  ;;  %vm166_vm9 = vcmp.eq.s32.totalorder %v128_v53, %v2652_v36  ;;  %vm1542_vm7 = vcmask 1045508  }
  0xbb   :  { %vm2034_vm10 = vmpackc.low %vm167_vm8, %vm166_vm9  ;;  %vm519_vm8 = vsmask.f32 3328  ;;  %vm520_vm9 = vsmask.f32 7440 }
  0xbc   :  { %2308 = vmatprep.mubr.msk.bf16.mxu0 %vm2034_vm10, %v2536_v39  ;;  %vm2770_vm10 = vmor %vm1013_vm4, %vm1014_vm5  ;;  %vm1898_vm4 = vcmask 1043459   ;;  %vm1900_vm5 = vcmask 1044484  }
  0xbd   :  { %v137_v54 = vpop.permute.xlu1 %136  ;;  %v134_v55 = vpop.permute.xlu0 %133 }
  0xbe   :  { %vm169_vm11 = vcmp.eq.s32.totalorder %v137_v54, %v2652_v36  ;;  %vm168_vm12 = vcmp.eq.s32.totalorder %v134_v55, %v2652_v36 }
  0xbf   :  { %vm2036_vm13 = vmpackc.low %vm169_vm11, %vm168_vm12  ;;  %vm750_vm12 = vcmask 261120  }
  0xc0   :  { %vm2786_vm11 = vmor %vm1541_vm6, %vm1542_vm7  ;;  %vm1902_vm6 = vcmask 1045509   ;;  %vm1904_vm7 = vcmask 1046534  }
  0xc1   :  { %v143_v56 = vpop.permute.xlu1 %142  ;;  %v140_v57 = vpop.permute.xlu0 %139 }
  0xc2   :  { %vm171_vm14 = vcmp.eq.s32.totalorder %v143_v56, %v2652_v36  ;;  %2309 = vmatmul.mubr.msk.bf16.gmra.mxu0 %vm2036_vm13, %v2536_v39  ;;  %vm170_vm15 = vcmp.eq.s32.totalorder %v140_v57, %v2652_v36  ;;  %vm2852_vm13 = vmor %vm519_vm8, %vm520_vm9  ;;  %vm1906_vm8 = vcmask 1047559  }
  0xc3   :  { %vm2038_vm0 = vmpackc.low %vm171_vm14, %vm170_vm15  ;;  %vm1245_vm14 = vsmask.f32 2304  ;;  %vm1246_vm15 = vsmask.f32 6416 }
  0xc4   :  { %2312 = vmatprep.mubr.msk.bf16.mxu0 %vm2038_vm0, %v2536_v39  ;;  %vm2964_vm0 = vmor %vm1245_vm14, %vm1246_vm15 }
  0xc5   :  { %v149_v58 = vpop.permute.xlu1 %148  ;;  %v146_v59 = vpop.permute.xlu0 %145 }
  0xc6   :  { %vm173_vm1 = vcmp.eq.s32.totalorder %v149_v58, %v2652_v36  ;;  %vm172_vm2 = vcmp.eq.s32.totalorder %v146_v59, %v2652_v36 }
  0xc7   :  { %vm2040_vm3 = vmpackc.low %vm173_vm1, %vm172_vm2  ;;  %vm2538_vm1 = vmmov 0   ;;  %vm1894_vm2 = vcmask 1041409  }
  0xca   :  { %2313 = vmatmul.mubr.msk.bf16.gmra.mxu0 %vm2040_vm3, %v2536_v39  ;;  %vm1896_vm3 = vcmask 1042434  }
 0x162   :  { %v2294_v0 = vpop.f32.mrf.mxu0 }
 0x163   :  { %v2696_v1 = vpack.c.bf16 %v2294_v0, %v2294_v0 }
 0x164   :  { %v2698_v2 = vpop.f32.mrf.mxu0 }
 0x165   :  { %3859 = vst [vmem:[#allocation8_spill] sm:$0xff] %v2698_v2  ;;  %v2702_v3 = vpack.c.bf16 %v2698_v2, %v2698_v2  ;;  %v542_v6 = vshll.u32 %v2696_v1, 16  ;;  %v1257_v8 = vshrl.u32 %v2696_v1, 16 }
 0x166   :  { %v2295_v4 = vpop.f32.mrf.mxu0 }
 0x167   :  { %v428_v5 = vpack.c.bf16 %v2295_v4, %v2294_v0  ;;  %v523_v9 = vshrl.u32 %v2702_v3, 16  ;;  %v2709_v10 = vpack.c.bf16 %v2295_v4, %v2295_v4  ;;  %v526_v12 = vshll.u32 %v2702_v3, 16 }
 0x168   :  { %v2705_v7 = vpop.f32.mrf.mxu0  ;;  %v2719_v18 = vrot.slane %v1257_v8, 5  ;;  %v2721_v19 = vrot.slane %v542_v6, 6  ;;  %v2737_v26 = vrot.slane %v542_v6, 5  ;;  %v3870_v8 = vmov 0 }
 0x169   :  { %3860 = vst [vmem:[#allocation9_spill] sm:$0xff] %v2705_v7  ;;  %v547_v14 = vshrl.u32 %v2709_v10, 16  ;;  %v550_v15 = vshll.u32 %v2709_v10, 16  ;;  %v2723_v20 = vrot.slane %v523_v9, 4  ;;  %v2725_v21 = vrot.slane %v526_v12, 5 }
 0x16a   :  { %v2714_v13 = vpop.f32.mrf.mxu0  ;;  %v2727_v22 = vrot.slane %v523_v9, 5  ;;  %v2729_v23 = vrot.slane %v526_v12, 6  ;;  %v2733_v24 = vpack.c.bf16 %v2705_v7, %v2705_v7  ;;  %v2744_v36 = vunpack.c.h.b16 %v428_v5 }
 0x16b   :  { %3861 = vst [vmem:[#allocation10_spill] sm:$0xff] %v2714_v13  ;;  %v549_v30 = vrot.slane %v547_v14, 4  ;;  %v552_v31 = vrot.slane %v550_v15, 5  ;;  %v1263_v32 = vrot.slane %v547_v14, 5  ;;  %v1264_v33 = vrot.slane %v550_v15, 6 }
 0x16c   :  { %v348_v16 = vpop.f32.mrf.mxu0  ;;  %3863 = vst [vmem:[#allocation12_spill] sm:$0xff] %v2744_v36  ;;  %v2095_v37 = vrot.slane %v2709_v10, 9  ;;  %v2139_v38 = vrot.slane %v2709_v10, 10  ;;  %v532_v39 = vshll.u32 %v2733_v24, 16  ;;  %v2751_v40 = vpack.c.bf16 %v2714_v13, %v2714_v13 }
 0x16d   :  { %v529_v42 = vor.u32 %v2725_v21, %v2723_v20  ;;  %v536_v44 = vshrl.u32 %v2733_v24, 16  ;;  %v2169_v45 = vpack.c.bf16 %v348_v16, %v348_v16  ;;  %v553_v48 = vor.u32 %v552_v31, %v549_v30 }
 0x16e   :  { %v2735_v25 = vpop.f32.mrf.mxu0  ;;  %v1265_v49 = vor.u32 %v1264_v33, %v1263_v32  ;;  %v3802_v50 = vrot.slane %v2733_v24, 5  ;;  %v3800_v51 = vrot.slane %v2733_v24, 6  ;;  %v3806_v57 = vshrl.u32 %v2751_v40, 16 }
 0x16f   :  { %3862 = vst [vmem:[#allocation11_spill] sm:$0xff] %v2735_v25  ;;  %v556_v52 = vshll.u32 %v2169_v45, 16  ;;  %v560_v53 = vshrl.u32 %v2169_v45, 16  ;;  %v1025_v54 = vrot.slane %v2169_v45, 5  ;;  %v1553_v55 = vrot.slane %v2169_v45, 6 }
 0x170   :  { %v351_v34 = vpop.f32.mrf.mxu0  ;;  %v3805_v58 = vshll.u32 %v2751_v40, 16  ;;  %v2776_v0 = vrot.slane %v532_v39, 5  ;;  %v3871_v8 = vsel %vm2786_vm11, 4294967295, %v3870_v8  ;;  %v538_v9 = vrot.slane %v536_v44, 4 }
 0x171   :  { %v429_v47 = vpack.c.bf16 %v351_v34, %v348_v16  ;;  %v2170_v61 = vpack.c.bf16 %v351_v34, %v351_v34  ;;  %v2778_v4 = vrot.slane %v556_v52, 5  ;;  %v562_v5 = vrot.slane %v560_v53, 4  ;;  %3872 = vst [vmem:[#allocation17_spill] sm:$0xff] %v3871_v8 }
 0x172   :  { %v2753_v41 = vpop.f32.mrf.mxu0  ;;  %v2782_v6 = vsel %vm2770_vm10, %v2095_v37, %v1025_v54  ;;  %v2792_v10 = vrot.slane %v3802_v50, 4  ;;  %v2796_v12 = vsel %vm2786_vm11, %v2139_v38, %v1553_v55  ;;  %v2800_v14 = vpack.c.bf16 %v2735_v25, %v2735_v25 }
 0x173   :  { %3864 = vst [vmem:[#allocation13_spill] sm:$0xff] %v2753_v41  ;;  %v2774_v60 = vunpack.c.l.b16 %v429_v47  ;;  %3869 = vst [vmem:[#allocation16_spill] sm:$0xff] %v2782_v6  ;;  %v554_v15 = vrot.slane %v553_v48, 4  ;;  %v2802_v16 = vrot.slane %v1265_v49, 4  ;;  %v2804_v30 = vrot.slane %v536_v44, 5 }
 0x174   :  { %v2764_v56 = vpop.f32.mrf.mxu0  ;;  %3873 = vst [vmem:[#allocation18_spill] sm:$0xff] %v2796_v12  ;;  %v1027_v31 = vrot.slane %v1025_v54, 4  ;;  %v563_v33 = vor.u32 %v562_v5, %v2778_v4  ;;  %v1267_v34 = vrot.slane %v560_v53, 5  ;;  %v566_v37 = vshll.u32 %v2170_v61, 16 }
 0x175   :  { %3865 = vst [vmem:[#allocation14_spill] sm:$0xff] %v2764_v56  ;;  %3868 = vst [vmem:[#allocation15_spill] sm:$0xff] %v2774_v60  ;;  %v1268_v45 = vrot.slane %v556_v52, 6  ;;  %v1555_v47 = vrot.slane %v1553_v55, 4  ;;  %v1028_v46 = vrot.slane %v2170_v61, 5  ;;  %v1556_v27 = vrot.slane %v2170_v61, 6 }
 0x176   :  { %v2806_v32 = vpop.f32.mrf.mxu0  ;;  %v2811_v11 = vrot.slane %v532_v39, 6  ;;  %v2815_v44 = vrot.slane %v3800_v51, 4  ;;  %v3803_v48 = vshrl.u32 %v2800_v14, 16  ;;  %v2820_v49 = vpack.c.bf16 %v2753_v41, %v2753_v41 }
 0x177   :  { %3874 = vst [vmem:[#allocation19_spill] sm:$0xff] %v2806_v32  ;;  %v3801_v53 = vrot.slane %v2800_v14, 5  ;;  %v3804_v54 = vrot.slane %v2800_v14, 6  ;;  %v2826_v52 = vsel %vm2770_vm10, %v1027_v31, %v1028_v46  ;;  %v2830_v39 = vsel %vm2786_vm11, %v1555_v47, %v1556_v27 }
 0x178   :  { %3875 = vst [vmem:[#allocation20_spill] sm:$0xff] %v2815_v44  ;;  %3876 = vst [vmem:[#allocation21_spill] sm:$0xff] %v2820_v49  ;;  %v2832_v55 = vpop.f32.mrf.mxu0  ;;  %v564_v5 = vrot.slane %v563_v33, 4  ;;  %v568_v38 = vrot.slane %v566_v37, 5  ;;  %v2841_v46 = vrot.slane %v3806_v57, 5  ;;  %v2843_v31 = vor.u32 %v1268_v45, %v1267_v34 }
 0x179   :  { %3877 = vst [vmem:[#allocation22_spill] sm:$0xff] %v2826_v52  ;;  %3878 = vst [vmem:[#allocation23_spill] sm:$0xff] %v2830_v39  ;;  %v1272_v27 = vshrl.u32 %v2170_v61, 16  ;;  %v2847_v33 = vrot.slane %v3805_v58, 6  ;;  %v530_v29 = vrot.slane %v529_v42, 4  ;;  %v539_v34 = vor.u32 %v538_v9, %v2776_v0  ;;  %v2478_v52 = vld [vmem:[%s3795_s2 + $0x30] sm:$0xff]  }
 0x17a   :  { %3879 = vst [vmem:[#allocation24_spill] sm:$0xff] %v2832_v55  ;;  %v559_v61 = vsel %vm2852_vm13, %v554_v15, %v2778_v4  ;;  %v2865_v45 = vrot.slane %v3801_v53, 4  ;;  %v604_v47 = vshll.u32 %v2820_v49, 16  ;;  %v2870_v17 = vpack.c.bf16 %v2806_v32, %v2806_v32  ;;  %v2872_v28 = vpop.f32.mrf.mxu0 }
 0x17b   :  { %3884 = vst [vmem:[#allocation27_spill] sm:$0xff] %v2872_v28  ;;  %v2876_v20 = vrot.slane %v3803_v48, 5  ;;  %v2880_v21 = vrot.slane %v3804_v54, 4  ;;  %v569_v42 = vsel %vm2852_vm13, %v564_v5, %v568_v38  ;;  %v2886_v4 = vpack.c.bf16 %v2764_v56, %v2764_v56 }
 0x17c   :  { %3882 = vst [vmem:[#allocation25_spill] sm:$0xff] %v2865_v45  ;;  %3883 = vst [vmem:[#allocation26_spill] sm:$0xff] %v2870_v17  ;;  %v2889_v15 = vrot.slane %v1272_v27, 5  ;;  %v2891_v53 = vrot.slane %v566_v37, 6  ;;  %v608_v50 = vshrl.u32 %v2820_v49, 16  ;;  %v3811_v48 = vrot.slane %v2820_v49, 5  ;;  %v2903_v37 = vpop.f32.mrf.mxu0 }
 0x17d   :  { %3885 = vst [vmem:[#allocation28_spill] sm:$0xff] %v2880_v21  ;;  %v614_v54 = vshll.u32 %v2870_v17, 16  ;;  %v1302_v35 = vshrl.u32 %v2870_v17, 16  ;;  %v540_v58 = vrot.slane %v539_v34, 4  ;;  %v2067_v38 = vcombine.low %v559_v61, %v569_v42  ;;  %3886 = vst [vmem:[#allocation29_spill] sm:$0xff] %v2903_v37 }
 0x17e   :  { %v2897_v5 = vrot.slane %v604_v47, 5  ;;  %v535_v27 = vsel %vm2852_vm13, %v530_v29, %v2776_v0  ;;  %v1287_v9 = vshrl.u32 %v2886_v4, 16  ;;  %v2911_v34 = vpack.c.bf16 %v2832_v55, %v2832_v55 }
 0x17f   :  { %v545_v43 = vsel %vm2852_vm13, %v540_v58, %v2737_v26  ;;  %v2915_v61 = vpack.c.bf16 %v2872_v28, %v2872_v28  ;;  %v2919_v29 = vrot.slane %v608_v50, 4  ;;  %v2921_v0 = vrot.slane %v608_v50, 5 }
 0x180   :  { %3887 = vst [vmem:[#allocation30_spill] sm:$0xff] %v2911_v34  ;;  %v2066_v57 = vcombine.low %v535_v27, %v545_v43  ;;  %v2925_v39 = vrot.slane %v3811_v48, 4  ;;  %v2927_v26 = vrot.slane %v604_v47, 6  ;;  %v2929_v58 = vrot.slane %v1302_v35, 5  ;;  %v2944_v35 = vpop.f32.mrf.mxu0 }
 0x181   :  { %3888 = vst [vmem:[#allocation31_spill] sm:$0xff] %v2915_v61  ;;  %v2931_v12 = vrot.slane %v614_v54, 6  ;;  %v3890_v42 = vrot.slane %v2820_v49, 6  ;;  %3892 = vst [vmem:[#allocation34_spill] sm:$0xff] %v2944_v35  ;;  %v2946_v47 = vrot.slane %v1287_v9, 5  ;;  %v595_v48 = vshrl.u32 %v2911_v34, 16 }
 0x182   :  { %3889 = vst [vmem:[#allocation32_spill] sm:$0xff] %v2925_v39  ;;  %2320 = vmatprep.mubr.msk.bf16.mxu0 %vm750_vm12, %v2066_v57  ;;  %v638_v28 = vshll.u32 %v2915_v61, 16  ;;  %v1317_v13 = vshrl.u32 %v2915_v61, 16  ;;  %v598_v27 = vshll.u32 %v2911_v34, 16  ;;  %v1254_v57 = vor.u32 %v2811_v11, %v2804_v30  ;;  %v2980_v60 = vpop.f32.mrf.mxu0 }
 0x183   :  { %v2938_v6 = vrot.slane %v3890_v42, 4  ;;  %2321 = vmatmul.mubr.msk.bf16.vlgmr.msra.gmra.mxu0 %vm750_vm12, %v2067_v38  ;;  %v2952_v42 = vrot.slane %v614_v54, 5  ;;  %v3895_v54 = vor.u32 %v2729_v23, %v2727_v22  ;;  %v3897_v43 = vshrl.u32 %v2751_v40, 16  ;;  %3899 = vst [vmem:[#allocation36_spill] sm:$0xff] %v2980_v60 }
 0x184   :  { %2377 = vmatpush3.bf16.msra.mxu0 %v2687_v62  ;;  %v2973_v62 = vpack.c.bf16 %v2903_v37, %v2903_v37  ;;  %v1256_v30 = vrot.slane %v1254_v57, 4  ;;  %v3898_v25 = vshll.u32 %v2751_v40, 16  ;;  %v2982_v32 = vrot.slane %v595_v48, 4 }
 0x185   :  { %3891 = vst [vmem:[#allocation33_spill] sm:$0xff] %v2938_v6  ;;  %v1251_v50 = vrot.slane %v3895_v54, 4  ;;  %2378 = vmatprep.subr.bf16.mxu0 %v2478_v52  ;;  %v573_v9 = vrot.slane %v3897_v43, 4  ;;  %v2984_v22 = vrot.slane %v1317_v13, 5  ;;  %v2986_v23 = vrot.slane %v638_v28, 6 }
 0x186   :  { %3896 = vst [vmem:[#allocation35_spill] sm:$0xff] %v2973_v62  ;;  %v576_v36 = vrot.slane %v3898_v25, 5  ;;  %v2990_v54 = vpack.c.bf16 %v2944_v35, %v2944_v35  ;;  %v2992_v11 = vrot.slane %v598_v27, 5  ;;  %v2994_v37 = vrot.slane %v595_v48, 5 }
 0x187   :  { %v1255_v43 = vsel %vm2964_vm0, %v1251_v50, %v1254_v57  ;;  %v3901_v25 = vor.u32 %v2721_v19, %v2719_v18  ;;  %v3003_v41 = vrot.slane %v598_v27, 6  ;;  %v619_v35 = vshrl.u32 %v2973_v62, 16  ;;  %v3011_v57 = vpop.f32.mrf.mxu0 }
 0x188   :  { %3900 = vst [vmem:[#allocation37_spill] sm:$0xff] %v2990_v54  ;;  %2379 = vmatpush3.bf16.msra.mxu0 %v2478_v52  ;;  %v622_v56 = vshll.u32 %v2973_v62, 16  ;;  %v3007_v6 = vrot.slane %v638_v28, 5  ;;  %v577_v21 = vor.u32 %v576_v36, %v573_v9  ;;  %v580_v50 = vshll.u32 %v2800_v14, 16  ;;  %3902 = vst [vmem:[#allocation38_spill] sm:$0xff] %v3011_v57 }
 0x189   :  { %v1262_v13 = vsel %vm2964_vm0, %v1256_v30, %v3901_v25  ;;  %v643_v27 = vshrl.u32 %v2990_v54, 16  ;;  %v646_v28 = vshll.u32 %v2990_v54, 16  ;;  %v3903_v36 = vshrl.u32 %v2800_v14, 16  ;;  %v3034_v2 = vpop.f32.mrf.mxu0 }
 0x18a   :  { %v2120_v55 = vcombine.low %v1255_v43, %v1262_v13  ;;  %v582_v30 = vrot.slane %v580_v50, 5  ;;  %v590_v43 = vshll.u32 %v2886_v4, 16  ;;  %v3023_v25 = vrot.slane %v619_v35, 4  ;;  %3905 = vst [vmem:[#allocation40_spill] sm:$0xff] %v3034_v2 }
 0x18b   :  { %v586_v9 = vrot.slane %v3903_v36, 4  ;;  %v3025_v13 = vrot.slane %v622_v56, 5  ;;  %v578_v48 = vrot.slane %v577_v21, 4  ;;  %v3032_v44 = vpack.c.bf16 %v2980_v60, %v2980_v60  ;;  %v3059_v17 = vpop.f32.mrf.mxu0 }
 0x18c   :  { %2380 = vmatprep.mubr.msk.bf16.mxu0 %vm750_vm12, %v2120_v55  ;;  %v3028_v55 = vrot.slane %v619_v35, 5  ;;  %v592_v18 = vrot.slane %v590_v43, 5  ;;  %v3036_v36 = vrot.slane %v622_v56, 6  ;;  %v3042_v19 = vpack.c.bf16 %v3011_v57, %v3011_v57  ;;  %3907 = vst [vmem:[#allocation42_spill] sm:$0xff] %v3059_v17 }
 0x18d   :  { %v587_v52 = vor.u32 %v586_v9, %v582_v30  ;;  %3904 = vst [vmem:[#allocation39_spill] sm:$0xff] %v3032_v44  ;;  %v3044_v21 = vrot.slane %v643_v27, 4  ;;  %v3046_v35 = vrot.slane %v646_v28, 5  ;;  %v3048_v9 = vrot.slane %v643_v27, 5 }
 0x18e   :  { %3906 = vst [vmem:[#allocation41_spill] sm:$0xff] %v3042_v19  ;;  %v3050_v61 = vrot.slane %v646_v28, 6  ;;  %v583_v56 = vsel %vm2852_vm13, %v578_v48, %v582_v30  ;;  %v1283_v62 = vrot.slane %v580_v50, 6  ;;  %v1290_v7 = vrot.slane %v590_v43, 6 }
 0x18f   :  { %v588_v60 = vrot.slane %v587_v52, 4  ;;  %v628_v57 = vshll.u32 %v3032_v44, 16  ;;  %v632_v54 = vshrl.u32 %v3032_v44, 16  ;;  %v3837_v39 = vrot.slane %v3032_v44, 5 }
 0x190   :  { %v667_v28 = vshrl.u32 %v3042_v19, 16  ;;  %v670_v48 = vshll.u32 %v3042_v19, 16  ;;  %v3909_v30 = vrot.slane %v2843_v31, 4  ;;  %v1280_v43 = vor.u32 %v2847_v33, %v2841_v46  ;;  %v3095_v33 = vpop.f32.mrf.mxu0 }
 0x191   :  { %v593_v8 = vsel %vm2852_vm13, %v588_v60, %v592_v18  ;;  %v1270_v60 = vsel %vm2964_vm0, %v2802_v16, %v2843_v31  ;;  %v3908_v18 = vor.u32 %v2891_v53, %v2889_v15  ;;  %v1284_v50 = vor.u32 %v1283_v62, %v2876_v20  ;;  %3912 = vst [vmem:[#allocation45_spill] sm:$0xff] %v3095_v33 }
 0x192   :  { %v2068_v27 = vcombine.low %v583_v56, %v593_v8  ;;  %v1291_v52 = vor.u32 %v1290_v7, %v2946_v47  ;;  %v3083_v16 = vpack.c.bf16 %v3034_v2, %v3034_v2  ;;  %v3085_v53 = vrot.slane %v628_v57, 5 }
 0x193   :  { %v1277_v8 = vsel %vm2964_vm0, %v3909_v30, %v3908_v18  ;;  %v3087_v31 = vrot.slane %v632_v54, 4  ;;  %v3091_v15 = vrot.slane %v3837_v39, 4  ;;  %v3093_v46 = vrot.slane %v632_v54, 5 }
 0x194   :  { %2324 = vmatprep.mubr.msk.bf16.mxu1 %vm750_vm12, %v2068_v27  ;;  %v2121_v56 = vcombine.low %v1270_v60, %v1277_v8  ;;  %3910 = vst [vmem:[#allocation43_spill] sm:$0xff] %v3083_v16  ;;  %v3097_v27 = vrot.slane %v628_v57, 6  ;;  %v1281_v7 = vrot.slane %v1280_v43, 4  ;;  %v1286_v20 = vrot.slane %v1284_v50, 4 }
 0x195   :  { %3911 = vst [vmem:[#allocation44_spill] sm:$0xff] %v3091_v15  ;;  %v3102_v47 = vpack.c.bf16 %v3059_v17, %v3059_v17  ;;  %v3914_v62 = vrot.slane %v3032_v44, 6  ;;  %v652_v18 = vshll.u32 %v3083_v16, 16  ;;  %v656_v54 = vshrl.u32 %v3083_v16, 16 }
 0x196   :  { %2381 = vmatmul.mubr.msk.bf16.vlgmr.msra.gmra.mxu0 %vm750_vm12, %v2121_v56  ;;  %v601_v57 = vor.u32 %v2992_v11, %v2982_v32  ;;  %v3112_v30 = vrot.slane %v667_v28, 4  ;;  %v1285_v8 = vsel %vm2964_vm0, %v1281_v7, %v1284_v50  ;;  %v1292_v43 = vsel %vm2964_vm0, %v1286_v20, %v1291_v52 }
 0x197   :  { %3913 = vst [vmem:[#allocation46_spill] sm:$0xff] %v3102_v47  ;;  %v3106_v60 = vrot.slane %v3914_v62, 4  ;;  %v3840_v56 = vrot.slane %v3083_v16, 5  ;;  %v3119_v39 = vrot.slane %v670_v48, 5  ;;  %v3121_v62 = vrot.slane %v667_v28, 5 }
 0x198   :  { %v3123_v17 = vrot.slane %v670_v48, 6  ;;  %v2122_v2 = vcombine.low %v1285_v8, %v1292_v43  ;;  %v676_v50 = vshll.u32 %v3102_v47, 16  ;;  %v680_v7 = vshrl.u32 %v3102_v47, 16 }
 0x199   :  { %3915 = vst [vmem:[#allocation47_spill] sm:$0xff] %v3106_v60  ;;  %v3125_v60 = vpop.f32.mrf.mxu0  ;;  %v3132_v52 = vrot.slane %v652_v18, 5  ;;  %v3134_v20 = vrot.slane %v656_v54, 4  ;;  %v602_v28 = vrot.slane %v601_v57, 4  ;;  %v611_v48 = vor.u32 %v2919_v29, %v2897_v5 }
 0x19a   :  { %3916 = vst [vmem:[#allocation48_spill] sm:$0xff] %v3125_v60  ;;  %2384 = vmatprep.mubr.msk.bf16.mxu0 %vm750_vm12, %v2122_v2  ;;  %v3140_v8 = vrot.slane %v3840_v56, 4  ;;  %v3142_v43 = vrot.slane %v656_v54, 5  ;;  %v3146_v32 = vpack.c.bf16 %v3095_v33, %v3095_v33  ;;  %v3150_v2 = vpack.c.bf16 %v3125_v60, %v3125_v60 }
 0x19b   :  { %v607_v29 = vsel %vm2852_vm13, %v602_v28, %v2897_v5  ;;  %v612_v56 = vrot.slane %v611_v48, 4  ;;  %v3157_v19 = vpop.f32.mrf.mxu0  ;;  %v3159_v54 = vrot.slane %v652_v18, 6  ;;  %v1295_v60 = vor.u32 %v3003_v41, %v2994_v37  ;;  %v2480_v41 = vld [vmem:[%s3795_s2] sm:$0xff]  }
 0x19c   :  { %3917 = vst [vmem:[#allocation49_spill] sm:$0xff] %v3140_v8  ;;  %3918 = vst [vmem:[#allocation50_spill] sm:$0xff] %v3146_v32  ;;  %v662_v33 = vshll.u32 %v3146_v32, 16  ;;  %v1332_v8 = vshrl.u32 %v3146_v32, 16  ;;  %v3920_v11 = vrot.slane %v3083_v16, 6  ;;  %v3169_v57 = vrot.slane %v676_v50, 5 }
 0x19d   :  { %3919 = vst [vmem:[#allocation51_spill] sm:$0xff] %v3157_v19  ;;  %v3171_v44 = vrot.slane %v680_v7, 4  ;;  %v617_v5 = vsel %vm2852_vm13, %v612_v56, %v2952_v42  ;;  %v3176_v18 = vrot.slane %v680_v7, 5  ;;  %v700_v48 = vshll.u32 %v3150_v2, 16  ;;  %v3194_v7 = vpop.f32.mrf.mxu0 }
 0x19e   :  { %v3167_v15 = vrot.slane %v3920_v11, 4  ;;  %v2069_v28 = vcombine.low %v607_v29, %v617_v5  ;;  %v704_v34 = vshrl.u32 %v3150_v2, 16  ;;  %v3922_v37 = vrot.slane %v3102_v47, 5  ;;  %3926 = vst [vmem:[#allocation55_spill] sm:$0xff] %v3194_v7 }
 0x19f   :  { %v3924_v16 = vrot.slane %v3102_v47, 6  ;;  %v3197_v29 = vrot.slane %v1332_v8, 5  ;;  %v3199_v5 = vrot.slane %v662_v33, 6  ;;  %v3208_v56 = vpack.c.bf16 %v3157_v19, %v3157_v19 }
 0x1a0   :  { %3921 = vst [vmem:[#allocation52_spill] sm:$0xff] %v3167_v15  ;;  %v3185_v11 = vrot.slane %v3922_v37, 4  ;;  %v3187_v15 = vrot.slane %v676_v50, 6  ;;  %2325 = vmatmul.mubr.msk.bf16.vlgmr.msra.gmra.mxu1 %vm750_vm12, %v2069_v28  ;;  %v1296_v37 = vrot.slane %v1295_v60, 4  ;;  %v3211_v8 = vrot.slane %v662_v33, 5 }
 0x1a1   :  { %v3191_v42 = vrot.slane %v3924_v16, 4  ;;  %v1299_v16 = vor.u32 %v2927_v26, %v2921_v0  ;;  %2337 = vmatpush3.bf16.msra.mxu1 %v2693_v63  ;;  %v3213_v28 = vrot.slane %v700_v48, 5  ;;  %v3219_v60 = vpack.c.bf16 %v3194_v7, %v3194_v7  ;;  %v3224_v0 = vld [vmem:[%s3795_s2 + $0x28] sm:$0xff]  }
 0x1a2   :  { %3923 = vst [vmem:[#allocation53_spill] sm:$0xff] %v3185_v11  ;;  %2338 = vmatprep.subr.bf16.mxu1 %v2480_v41  ;;  %v686_v33 = vshll.u32 %v3208_v56, 16  ;;  %v625_v49 = vor.u32 %v3025_v13, %v3023_v25  ;;  %v3233_v50 = vrot.slane %v704_v34, 5  ;;  %v3235_v7 = vrot.slane %v700_v48, 6 }
 0x1a3   :  { %3925 = vst [vmem:[#allocation54_spill] sm:$0xff] %v3191_v42  ;;  %v3215_v42 = vrot.slane %v704_v34, 4  ;;  %v1300_v26 = vsel %vm2964_vm0, %v1296_v37, %v1299_v16  ;;  %v1301_v63 = vrot.slane %v1299_v16, 4  ;;  %v1347_v19 = vshrl.u32 %v3208_v56, 16 }
 0x1a4   :  { %v3927_v47 = vrot.slane %v3150_v2, 5  ;;  %v3929_v37 = vrot.slane %v3150_v2, 6  ;;  %v3931_v25 = vor.u32 %v2931_v12, %v2929_v58  ;;  %v710_v34 = vshll.u32 %v3219_v60, 16 }
 0x1a5   :  { %2339 = vmatpush3.bf16.msra.mxu1 %v2480_v41  ;;  %v1063_v11 = vrot.slane %v3208_v56, 5  ;;  %v626_v12 = vrot.slane %v625_v49, 4  ;;  %v635_v58 = vor.u32 %v3087_v31, %v3085_v53  ;;  %v1349_v41 = vrot.slane %v1347_v19, 5 }
 0x1a6   :  { %v3240_v32 = vrot.slane %v3927_v47, 4  ;;  %v3244_v16 = vrot.slane %v3929_v37, 4  ;;  %v1307_v13 = vsel %vm2964_vm0, %v1301_v63, %v3931_v25  ;;  %v1362_v47 = vshrl.u32 %v3219_v60, 16  ;;  %2356 = vmatprep.subr.bf16.mxu1 %v3224_v0 }
 0x1a7   :  { %v2123_v48 = vcombine.low %v1300_v26, %v1307_v13  ;;  %v688_v37 = vrot.slane %v686_v33, 5  ;;  %v1310_v63 = vor.u32 %v3036_v36, %v3028_v55  ;;  %v1314_v25 = vor.u32 %v3097_v27, %v3093_v46 }
 0x1a8   :  { %3928 = vst [vmem:[#allocation56_spill] sm:$0xff] %v3240_v32  ;;  %3930 = vst [vmem:[#allocation57_spill] sm:$0xff] %v3244_v16  ;;  %v3255_v32 = vpop.f32.mrf.mxu0  ;;  %v1350_v16 = vrot.slane %v686_v33, 6  ;;  %v3266_v13 = vrot.slane %v1362_v47, 5  ;;  %v3268_v45 = vrot.slane %v710_v34, 6  ;;  %v636_v33 = vrot.slane %v635_v58, 4 }
 0x1a9   :  { %2385 = vmatmul.mubr.msk.bf16.gmra.mxu0 %vm750_vm12, %v2123_v48  ;;  %v3272_v49 = vpack.c.bf16 %v3255_v32, %v3255_v32  ;;  %v3274_v31 = vrot.slane %v710_v34, 5  ;;  %v1311_v19 = vrot.slane %v1310_v63, 4  ;;  %v1316_v48 = vrot.slane %v1314_v25, 4 }
 0x1aa   :  { %v649_v26 = vor.u32 %v3046_v35, %v3044_v21  ;;  %v631_v55 = vsel %vm2852_vm13, %v626_v12, %v3085_v53  ;;  %v641_v36 = vsel %vm2852_vm13, %v636_v33, %v3007_v6  ;;  %v3932_v21 = vor.u32 %v2986_v23, %v2984_v22 }
 0x1ab   :  { %v691_v46 = vshrl.u32 %v3272_v49, 16  ;;  %v694_v27 = vshll.u32 %v3272_v49, 16  ;;  %v2070_v47 = vcombine.low %v631_v55, %v641_v36  ;;  %v1315_v58 = vsel %vm2964_vm0, %v1311_v19, %v1314_v25 }
 0x1ac   :  { %v1322_v35 = vsel %vm2964_vm0, %v1316_v48, %v3932_v21  ;;  %v1351_v53 = vor.u32 %v1350_v16, %v1349_v41  ;;  %v1366_v6 = vor.u32 %v3268_v45, %v3266_v13  ;;  %v650_v36 = vrot.slane %v649_v26, 4 }
 0x1ad   :  { %v2124_v12 = vcombine.low %v1315_v58, %v1322_v35  ;;  %v693_v63 = vrot.slane %v691_v46, 4  ;;  %2328 = vmatprep.mubr.msk.bf16.mxu1 %vm750_vm12, %v2070_v47  ;;  %v696_v33 = vrot.slane %v694_v27, 5  ;;  %v1353_v34 = vrot.slane %v691_v46, 5 }
 0x1ae   :  { %v1354_v55 = vrot.slane %v694_v27, 6  ;;  %v659_v22 = vor.u32 %v3134_v20, %v3132_v52  ;;  %v1325_v23 = vor.u32 %v3050_v61, %v3048_v9  ;;  %v1329_v16 = vor.u32 %v3159_v54, %v3142_v43 }
 0x1af   :  { %2388 = vmatprep.mubr.msk.bf16.mxu0 %vm750_vm12, %v2124_v12  ;;  %v673_v45 = vor.u32 %v3119_v39, %v3112_v30  ;;  %v655_v41 = vsel %vm2852_vm13, %v650_v36, %v3132_v52  ;;  %v683_v26 = vor.u32 %v3171_v44, %v3169_v57  ;;  %v1340_v25 = vor.u32 %v3123_v17, %v3121_v62 }
 0x1b0   :  { %v1344_v20 = vor.u32 %v3187_v15, %v3176_v18  ;;  %v660_v61 = vrot.slane %v659_v22, 4  ;;  %v1326_v9 = vrot.slane %v1325_v23, 4  ;;  %v1331_v13 = vrot.slane %v1329_v16, 4 }
 0x1b1   :  { %v674_v43 = vrot.slane %v673_v45, 4  ;;  %v684_v54 = vrot.slane %v683_v26, 4  ;;  %v1341_v19 = vrot.slane %v1340_v25, 4  ;;  %v697_v30 = vor.u32 %v696_v33, %v693_v63  ;;  %v3943_v25 = vld [vmem:[#allocation30_spill] sm:$0xff] }
 0x1b2   :  { %v1346_v39 = vrot.slane %v1344_v20, 4  ;;  %v665_v52 = vsel %vm2852_vm13, %v660_v61, %v3211_v8  ;;  %v1330_v44 = vsel %vm2964_vm0, %v1326_v9, %v1329_v16  ;;  %v3933_v17 = vor.u32 %v3199_v5, %v3197_v29  ;;  %v3940_v16 = vld [vmem:[#allocation25_spill] sm:$0xff]  ;;  %v3945_v9 = vld [vmem:[#allocation26_spill] sm:$0xff] }
 0x1b3   :  { %v679_v62 = vsel %vm2852_vm13, %v674_v43, %v3169_v57  ;;  %v2071_v18 = vcombine.low %v655_v41, %v665_v52  ;;  %v689_v46 = vsel %vm2852_vm13, %v684_v54, %v688_v37  ;;  %v1345_v8 = vsel %vm2964_vm0, %v1341_v19, %v1344_v20  ;;  %v3941_v41 = vld [vmem:[#allocation21_spill] sm:$0xff]  ;;  %v3947_v43 = vld [vmem:[#allocation32_spill] sm:$0xff] }
 0x1b4   :  { %v1337_v15 = vsel %vm2964_vm0, %v1331_v13, %v3933_v17  ;;  %v2072_v27 = vcombine.low %v679_v62, %v689_v46  ;;  %v1352_v47 = vsel %vm2964_vm0, %v1346_v39, %v1351_v53  ;;  %v698_v29 = vrot.slane %v697_v30, 4 }
 0x1b5   :  { %v2125_v48 = vcombine.low %v1330_v44, %v1337_v15  ;;  %v707_v5 = vor.u32 %v3215_v42, %v3213_v28  ;;  %v2101_v58 = vrot.slane %v3272_v49, 9  ;;  %2329 = vmatmul.mubr.msk.bf16.gmra.mxu1 %vm750_vm12, %v2071_v18  ;;  %v2126_v57 = vcombine.low %v1345_v8, %v1352_v47  ;;  %v3948_v44 = vld [vmem:[#allocation39_spill] sm:$0xff]  ;;  %v3954_v8 = vld [vmem:[#allocation44_spill] sm:$0xff] }
 0x1b6   :  { %v1355_v21 = vor.u32 %v1354_v55, %v1353_v34  ;;  %v1359_v37 = vor.u32 %v3235_v7, %v3233_v50  ;;  %2332 = vmatprep.mubr.msk.bf16.mxu1 %vm750_vm12, %v2072_v27  ;;  %v703_v35 = vsel %vm2852_vm13, %v698_v29, %v3213_v28  ;;  %v3934_v42 = vrot.slane %v2733_v24, 5  ;;  %v3950_v15 = vld [vmem:[#allocation35_spill] sm:$0xff]  ;;  %v3957_v29 = vld [vmem:[#allocation37_spill] sm:$0xff] }
 0x1b7   :  { %2389 = vmatmul.mubr.msk.bf16.gmra.mxu0 %vm750_vm12, %v2125_v48  ;;  %v708_v53 = vrot.slane %v707_v5, 4  ;;  %v3935_v12 = vrot.slane %v2702_v3, 9  ;;  %v3936_v34 = vrot.slane %v2696_v1, 5  ;;  %v3937_v55 = vrot.slane %v2800_v14, 5  ;;  %v3952_v48 = vld [vmem:[#allocation31_spill] sm:$0xff] }
 0x1b8   :  { %2392 = vmatprep.mubr.msk.bf16.mxu0 %vm750_vm12, %v2126_v57  ;;  %v1356_v50 = vrot.slane %v1355_v21, 4  ;;  %v1361_v28 = vrot.slane %v1359_v37, 4  ;;  %v3938_v36 = vrot.slane %v2751_v40, 9  ;;  %v3939_v23 = vrot.slane %v2886_v4, 5  ;;  %v3955_v27 = vld [vmem:[#allocation43_spill] sm:$0xff]  ;;  %v3959_v21 = vld [vmem:[#allocation50_spill] sm:$0xff] }
 0x1b9   :  { %v3351_v63 = vsel %vm2770_vm10, %v3935_v12, %v3934_v42  ;;  %v3358_v7 = vsel %vm2770_vm10, %v2792_v10, %v3936_v34  ;;  %v713_v10 = vsel %vm2852_vm13, %v708_v53, %v3274_v31  ;;  %v3942_v26 = vrot.slane %v3941_v41, 5  ;;  %v3962_v42 = vld [vmem:[#allocation46_spill] sm:$0xff]  ;;  %v3964_v34 = vld [vmem:[#allocation41_spill] sm:$0xff] }
 0x1ba   :  { %v2102_v33 = vcombine.low %v3351_v63, %v3358_v7  ;;  %v3369_v22 = vsel %vm2770_vm10, %v3938_v36, %v3937_v55  ;;  %v3379_v45 = vsel %vm2770_vm10, %v3940_v16, %v3939_v23  ;;  %v3944_v20 = vrot.slane %v3943_v25, 9  ;;  %v3966_v36 = vld [vmem:[#allocation53_spill] sm:$0xff]  ;;  %v4025_v63 = vld [vmem:[#allocation18_spill] sm:$0xff]  ;;  %v4026_v7 = vld [vmem:[#allocation23_spill] sm:$0xff] }
 0x1bb   :  { %v3946_v13 = vrot.slane %v3945_v9, 5  ;;  %v2073_v31 = vcombine.low %v703_v35, %v713_v10  ;;  %v1360_v54 = vsel %vm2964_vm0, %v1356_v50, %v1359_v37  ;;  %v1367_v19 = vsel %vm2964_vm0, %v1361_v28, %v1366_v6  ;;  %v3961_v35 = vld [vmem:[#allocation49_spill] sm:$0xff] }
 0x1bc   :  { %v3387_v61 = vsel %vm2770_vm10, %v3944_v20, %v3942_v26  ;;  %v2104_v39 = vcombine.low %v3369_v22, %v3379_v45  ;;  %v2127_v30 = vcombine.low %v1360_v54, %v1367_v19  ;;  %v3949_v17 = vrot.slane %v3948_v44, 5  ;;  %v3969_v20 = vld [vmem:[#allocation56_spill] sm:$0xff] }
 0x1bd   :  { %v3394_v51 = vsel %vm2770_vm10, %v3947_v43, %v3946_v13  ;;  %v3951_v62 = vrot.slane %v3950_v15, 9  ;;  %v3953_v46 = vrot.slane %v3952_v48, 5  ;;  %v3956_v47 = vrot.slane %v3955_v27, 5  ;;  %2333 = vmatmul.mubr.msk.bf16.gmra.mxu1 %vm750_vm12, %v2073_v31 }
 0x1be   :  { %v2105_v52 = vcombine.low %v3387_v61, %v3394_v51  ;;  %v3958_v5 = vrot.slane %v3957_v29, 9  ;;  %v3960_v37 = vrot.slane %v3959_v21, 5  ;;  %v3963_v12 = vrot.slane %v3962_v42, 5  ;;  %v1878_v61 = vld [vmem:[%s3797_s4 + $0x78] sm:$0xff] }
 0x1bf   :  { %v3410_v18 = vsel %vm2770_vm10, %v3951_v62, %v3949_v17  ;;  %v3417_v38 = vsel %vm2770_vm10, %v3954_v8, %v3953_v46  ;;  %v3965_v50 = vrot.slane %v3964_v34, 9  ;;  %v3451_v10 = vsel %vm2770_vm10, %v3966_v36, %v1063_v11  ;;  %2393 = vmatmul.mubr.msk.bf16.gmra.mxu0 %vm750_vm12, %v2127_v30  ;;  %v3973_v62 = vld [vmem:[#allocation9_spill] sm:$0xff]  ;;  %v3977_v30 = vld [vmem:[#allocation20_spill] sm:$0xff]  ;;  %v4009_v17 = vld [vmem:[#allocation10_spill] sm:$0xff] }
 0x1c0   :  { %v2106_v6 = vcombine.low %v3410_v18, %v3417_v38  ;;  %v3427_v57 = vsel %vm2770_vm10, %v3958_v5, %v3956_v47  ;;  %v3434_v53 = vsel %vm2770_vm10, %v3961_v35, %v3960_v37  ;;  %v3967_v23 = vrot.slane %v3150_v2, 5  ;;  %v3981_v37 = vld [vmem:[#allocation28_spill] sm:$0xff]  ;;  %v3985_v36 = vld [vmem:[#allocation33_spill] sm:$0xff]  ;;  %v1876_v18 = vld [vmem:[%s3797_s4 + $0x68] sm:$0xff] }
 0x1c1   :  { %v3442_v28 = vsel %vm2770_vm10, %v3965_v50, %v3963_v12  ;;  %v2107_v55 = vcombine.low %v3427_v57, %v3434_v53  ;;  %v3968_v26 = vrot.slane %v3219_v60, 5  ;;  %v2145_v43 = vrot.slane %v3272_v49, 10  ;;  %v3974_v49 = vld [vmem:[#allocation8_spill] sm:$0xff]  ;;  %v1875_v38 = vld [vmem:[%s3797_s4 + $0x60] sm:$0xff]  ;;  %v1874_v57 = vld [vmem:[%s3797_s4 + $0x58] sm:$0xff] }
 0x1c2   :  { %v3457_v16 = vsel %vm2770_vm10, %v2101_v58, %v3967_v23  ;;  %v2108_v11 = vcombine.low %v3442_v28, %v3451_v10  ;;  %v3970_v54 = vrot.slane %v2733_v24, 6  ;;  %v3971_v19 = vrot.slane %v2702_v3, 10  ;;  %v1873_v28 = vld [vmem:[%s3797_s4 + $0x50] sm:$0xff]  ;;  %v1872_v10 = vld [vmem:[%s3797_s4 + $0x48] sm:$0xff] }
 0x1c3   :  { %v3464_v13 = vsel %vm2770_vm10, %v3969_v20, %v3968_v26  ;;  %v3975_v46 = vpack.c.bf16 %v3973_v62, %v3974_v49  ;;  %v3976_v31 = vrot.slane %v2696_v1, 6  ;;  %v3978_v24 = vrot.slane %v2800_v14, 6  ;;  %v3993_v49 = vld [vmem:[#allocation52_spill] sm:$0xff] }
 0x1c4   :  { %v2109_v58 = vcombine.low %v3457_v16, %v3464_v13  ;;  %v3479_v59 = vsel %vm2786_vm11, %v3971_v19, %v3970_v54  ;;  %v3979_v3 = vrot.slane %v2751_v40, 10  ;;  %v3980_v5 = vrot.slane %v2886_v4, 6  ;;  %v3989_v19 = vld [vmem:[#allocation47_spill] sm:$0xff]  ;;  %v1871_v13 = vld [vmem:[%s3797_s4 + $0x40] sm:$0xff] }
 0x1c5   :  { %2340 = vmatprep.mubr.msk.bf16.mxu1 %vm750_vm12, %v3975_v46  ;;  %v3490_v8 = vsel %vm2786_vm11, %v3977_v30, %v3976_v31  ;;  %v3982_v1 = vrot.slane %v3941_v41, 6  ;;  %v3983_v12 = vrot.slane %v3943_v25, 10  ;;  %v3984_v4 = vrot.slane %v3945_v9, 6 }
 0x1c6   :  { %v3498_v47 = vsel %vm2786_vm11, %v3979_v3, %v3978_v24  ;;  %v3505_v35 = vsel %vm2786_vm11, %v3981_v37, %v3980_v5  ;;  %v2146_v40 = vcombine.low %v3479_v59, %v3490_v8  ;;  %v3986_v41 = vrot.slane %v3948_v44, 6  ;;  %v3997_v24 = vld [vmem:[#allocation54_spill] sm:$0xff] }
 0x1c7   :  { %v3513_v14 = vsel %vm2786_vm11, %v3983_v12, %v3982_v1  ;;  %v2148_v50 = vcombine.low %v3498_v47, %v3505_v35  ;;  %v1571_v23 = vsel %vm2786_vm11, %v3985_v36, %v3984_v4  ;;  %v3987_v25 = vrot.slane %v3950_v15, 10  ;;  %v4001_v35 = vld [vmem:[#allocation14_spill] sm:$0xff]  ;;  %v4002_v1 = vld [vmem:[#allocation24_spill] sm:$0xff]  ;;  %v4003_v4 = vld [vmem:[#allocation13_spill] sm:$0xff] }
 0x1c8   :  { %v2149_v20 = vcombine.low %v3513_v14, %v1571_v23  ;;  %v3988_v54 = vrot.slane %v3952_v48, 6  ;;  %v3990_v9 = vrot.slane %v3955_v27, 6  ;;  %v3991_v62 = vrot.slane %v3957_v29, 10  ;;  %v4004_v36 = vld [vmem:[#allocation19_spill] sm:$0xff] }
 0x1c9   :  { %v1575_v26 = vsel %vm2786_vm11, %v3987_v25, %v3986_v41  ;;  %v3992_v15 = vrot.slane %v3959_v21, 6  ;;  %v3994_v48 = vrot.slane %v3962_v42, 6  ;;  %v3995_v8 = vrot.slane %v3964_v34, 10  ;;  %v4000_v42 = vld [vmem:[#allocation57_spill] sm:$0xff]  ;;  %v4005_v23 = vld [vmem:[#allocation15_spill] sm:$0xff]  ;;  %v4006_v41 = vld [vmem:[#allocation12_spill] sm:$0xff] }
 0x1ca   :  { %v1578_v59 = vsel %vm2786_vm11, %v3989_v19, %v3988_v54  ;;  %v1582_v44 = vsel %vm2786_vm11, %v3991_v62, %v3990_v9  ;;  %v3996_v29 = vrot.slane %v3208_v56, 6  ;;  %v3998_v47 = vrot.slane %v3150_v2, 6  ;;  %v2482_v56 = vld [vmem:[%s3795_s2 + $0x20] sm:$0xff]   ;;  %v2483_v54 = vld [vmem:[%s3795_s2 + $0x48] sm:$0xff]   ;;  %v4011_v9 = vld [vmem:[#allocation40_spill] sm:$0xff] }
 0x1cb   :  { %v1585_v46 = vsel %vm2786_vm11, %v3993_v49, %v3992_v15  ;;  %v2150_v31 = vcombine.low %v1575_v26, %v1578_v59  ;;  %v1589_v27 = vsel %vm2786_vm11, %v3995_v8, %v3994_v48  ;;  %v3999_v37 = vrot.slane %v3219_v60, 6  ;;  %v4008_v60 = vld [vmem:[#allocation11_spill] sm:$0xff]  ;;  %v4012_v62 = vld [vmem:[#allocation45_spill] sm:$0xff]  ;;  %v4016_v48 = vld [vmem:[#allocation34_spill] sm:$0xff] }
 0x1cc   :  { %v2151_v30 = vcombine.low %v1582_v44, %v1585_v46  ;;  %v1592_v3 = vsel %vm2786_vm11, %v3997_v24, %v3996_v29  ;;  %v1596_v5 = vsel %vm2786_vm11, %v2145_v43, %v3998_v47  ;;  %v431_v12 = vpack.c.bf16 %v4002_v1, %v4001_v35  ;;  %v4013_v15 = vld [vmem:[#allocation29_spill] sm:$0xff]  ;;  %v4015_v46 = vld [vmem:[#allocation27_spill] sm:$0xff] }
 0x1cd   :  { %v2152_v21 = vcombine.low %v1589_v27, %v1592_v3  ;;  %v1599_v34 = vsel %vm2786_vm11, %v4000_v42, %v3999_v37  ;;  %v432_v2 = vpack.c.bf16 %v4004_v36, %v4003_v4  ;;  %v4007_v43 = vpack.c.b16 %v4005_v23, %v4006_v41  ;;  %v4017_v3 = vld [vmem:[#allocation51_spill] sm:$0xff]  ;;  %v4019_v37 = vld [vmem:[#allocation42_spill] sm:$0xff]  ;;  %v4022_v36 = vld [vmem:[#allocation16_spill] sm:$0xff] }
 0x1ce   :  { %v2153_v14 = vcombine.low %v1596_v5, %v1599_v34  ;;  %v4010_v25 = vpack.c.bf16 %v4008_v60, %v4009_v17  ;;  %v460_v26 = vunpack.c.h.b16 %v431_v12  ;;  %v435_v44 = vpack.c.bf16 %v4012_v62, %v4011_v9  ;;  %v4018_v5 = vld [vmem:[#allocation38_spill] sm:$0xff]  ;;  %v4020_v34 = vld [vmem:[#allocation48_spill] sm:$0xff]  ;;  %v4021_v35 = vld [vmem:[#allocation55_spill] sm:$0xff] }
 0x1cf   :  { %2341 = vmatmul.mubr.msk.bf16.vlgmr.msra.gmra.mxu1 %vm750_vm12, %v4007_v43  ;;  %v461_v19 = vunpack.c.l.b16 %v432_v2  ;;  %v434_v8 = vpack.c.bf16 %v4016_v48, %v4015_v46  ;;  %v437_v47 = vpack.c.bf16 %v3255_v32, %v4017_v3  ;;  %v436_v42 = vpack.c.bf16 %v4019_v37, %v4018_v5  ;;  %v2484_v32 = vld [vmem:[%s3795_s2 + $0x40] sm:$0xff]   ;;  %v1866_v41 = vld [vmem:[%s3797_s4 + $0x18] sm:$0xff]  ;;  %v1865_v60 = vld [vmem:[%s3797_s4 + $0x10] sm:$0xff] }
 0x1d0   :  { %2357 = vmatpush3.bf16.msra.mxu1 %v3224_v0  ;;  %2344 = vmatprep.mubr.msk.bf16.mxu1 %vm750_vm12, %v4010_v25  ;;  %v4014_v0 = vld [vmem:[#allocation36_spill] sm:$0xff]  ;;  %v467_v27 = vunpack.c.l.b16 %v435_v44  ;;  %v438_v1 = vpack.c.bf16 %v4021_v35, %v4020_v34  ;;  %v4023_v2 = vld [vmem:[#allocation22_spill] sm:$0xff]  ;;  %v2537_v51 = vmov 0.0   ;;  %v1864_v25 = vld [vmem:[%s3797_s4 + $0x8] sm:$0xff] }
 0x1d1   :  { %2358 = vmatprep.subr.bf16.mxu1 %v2482_v56  ;;  %v875_v59 = vpack.c.b16 %v461_v19, %v460_v26  ;;  %v433_v49 = vpack.c.bf16 %v4014_v0, %v4013_v15  ;;  %v466_v29 = vunpack.c.h.b16 %v434_v8  ;;  %v472_v12 = vunpack.c.h.b16 %v437_v47  ;;  %2416 = vmatprep.subr.mxu0 %v2537_v51 }
 0x1d2   :  { %v4024_v23 = vcombine.low %v4022_v36, %v4023_v2  ;;  %2417 = vmatpush3.msra.mxu0 %v1878_v61  ;;  %2448 = vmatprep.mubr.msk.f32.mxu0 %vm2538_vm1, %v2537_v51 }
 0x1d3   :  { %v877_v24 = vpack.c.b16 %v467_v27, %v466_v29  ;;  %2418 = vmatprep.subr.mxu0 %v2537_v51 }
 0x1d4   :  { %2359 = vmatpush3.bf16.msra.mxu1 %v2482_v56  ;;  %v473_v56 = vunpack.c.l.b16 %v438_v1 }
 0x1d5   :  { %2396 = vmatprep.subr.bf16.mxu1 %v2483_v54 }
 0x1d6   :  { %v879_v4 = vpack.c.b16 %v473_v56, %v472_v12 }
 0x1d7   :  { %2345 = vmatmul.mubr.msk.bf16.gmra.mxu1 %vm750_vm12, %v875_v59 }
 0x1d8   :  { %2348 = vmatprep.mubr.msk.bf16.mxu1 %vm750_vm12, %v433_v49 }
 0x1df   :  { %2349 = vmatmul.mubr.msk.bf16.gmra.mxu1 %vm750_vm12, %v877_v24 }
 0x1e0   :  { %2352 = vmatprep.mubr.msk.bf16.mxu1 %vm750_vm12, %v436_v42 }
 0x1e7   :  { %2353 = vmatmul.mubr.msk.bf16.gmra.mxu1 %vm750_vm12, %v879_v4 }
 0x1e8   :  { %2360 = vmatprep.mubr.msk.bf16.mxu1 %vm750_vm12, %v2102_v33  ;;  %v4027_v33 = vcombine.low %v4025_v63, %v4026_v7 }
 0x1ef   :  { %2361 = vmatmul.mubr.msk.bf16.vlgmr.msra.gmra.mxu1 %vm750_vm12, %v4024_v23 }
 0x1f0   :  { %2397 = vmatpush3.bf16.msra.mxu1 %v2483_v54  ;;  %2364 = vmatprep.mubr.msk.bf16.mxu1 %vm750_vm12, %v2104_v39  ;;  %v1877_v39 = vld [vmem:[%s3797_s4 + $0x70] sm:$0xff]  ;;  %v1863_v54 = vld [vmem:[%s3797_s4] sm:$0xff] }
 0x1f1   :  { %2398 = vmatprep.subr.bf16.mxu1 %v2484_v32  ;;  %2419 = vmatpush3.msra.mxu0 %v1877_v39 }
 0x1f2   :  { %2420 = vmatprep.subr.mxu0 %v2537_v51 }
 0x1f3   :  { %2421 = vmatpush3.msra.mxu0 %v1876_v18 }
 0x1f4   :  { %2399 = vmatpush3.bf16.msra.mxu1 %v2484_v32  ;;  %2422 = vmatprep.subr.mxu0 %v2537_v51 }
 0x1f5   :  { %2423 = vmatpush3.msra.mxu0 %v1875_v38 }
 0x1f6   :  { %2424 = vmatprep.subr.mxu0 %v2537_v51 }
 0x1f7   :  { %2365 = vmatmul.mubr.msk.bf16.gmra.mxu1 %vm750_vm12, %v2105_v52  ;;  %2425 = vmatpush3.msra.mxu0 %v1874_v57 }
 0x1f8   :  { %2368 = vmatprep.mubr.msk.bf16.mxu1 %vm750_vm12, %v2106_v6  ;;  %2426 = vmatprep.subr.mxu0 %v2537_v51 }
 0x1f9   :  { %2427 = vmatpush3.msra.mxu0 %v1873_v28 }
 0x1fa   :  { %2428 = vmatprep.subr.mxu0 %v2537_v51 }
 0x1fb   :  { %2429 = vmatpush3.msra.mxu0 %v1872_v10 }
 0x1fc   :  { %2430 = vmatprep.subr.mxu0 %v2537_v51 }
 0x1fd   :  { %2431 = vmatpush3.msra.mxu0 %v1871_v13 }
 0x1fe   :  { %2432 = vmatprep.subr.mxu0 %v2537_v51 }
 0x1ff   :  { %2369 = vmatmul.mubr.msk.bf16.gmra.mxu1 %vm750_vm12, %v2107_v55 }
 0x200   :  { %2372 = vmatprep.mubr.msk.bf16.mxu1 %vm750_vm12, %v2108_v11 }
 0x207   :  { %2373 = vmatmul.mubr.msk.bf16.gmra.mxu1 %vm750_vm12, %v2109_v58  ;;  %v1870_v58 = vld [vmem:[%s3797_s4 + $0x38] sm:$0xff] }
 0x208   :  { %2400 = vmatprep.mubr.msk.bf16.mxu1 %vm750_vm12, %v2146_v40  ;;  %2433 = vmatpush3.msra.mxu0 %v1870_v58 }
 0x209   :  { %2434 = vmatprep.subr.mxu0 %v2537_v51 }
 0x20f   :  { %2401 = vmatmul.mubr.msk.bf16.vlgmr.msra.gmra.mxu1 %vm750_vm12, %v4027_v33 }
 0x210   :  { %2404 = vmatprep.mubr.msk.bf16.mxu1 %vm750_vm12, %v2148_v50  ;;  %v1869_v50 = vld [vmem:[%s3797_s4 + $0x30] sm:$0xff] }
 0x211   :  { %2435 = vmatpush3.msra.mxu0 %v1869_v50 }
 0x212   :  { %2436 = vmatprep.subr.mxu0 %v2537_v51 }
 0x217   :  { %2405 = vmatmul.mubr.msk.bf16.gmra.mxu1 %vm750_vm12, %v2149_v20 }
 0x218   :  { %2408 = vmatprep.mubr.msk.bf16.mxu1 %vm750_vm12, %v2150_v31  ;;  %v1868_v31 = vld [vmem:[%s3797_s4 + $0x28] sm:$0xff] }
 0x219   :  { %2437 = vmatpush3.msra.mxu0 %v1868_v31 }
 0x21a   :  { %2438 = vmatprep.subr.mxu0 %v2537_v51 }
 0x21f   :  { %2409 = vmatmul.mubr.msk.bf16.gmra.mxu1 %vm750_vm12, %v2151_v30 }
 0x220   :  { %2412 = vmatprep.mubr.msk.bf16.mxu1 %vm750_vm12, %v2152_v21  ;;  %v1867_v21 = vld [vmem:[%s3797_s4 + $0x20] sm:$0xff] }
 0x221   :  { %2439 = vmatpush3.msra.mxu0 %v1867_v21 }
 0x222   :  { %2440 = vmatprep.subr.mxu0 %v2537_v51 }
 0x223   :  { %2441 = vmatpush3.msra.mxu0 %v1866_v41 }
 0x224   :  { %2442 = vmatprep.subr.mxu0 %v2537_v51 }
 0x225   :  { %2443 = vmatpush3.msra.mxu0 %v1865_v60 }
 0x226   :  { %2444 = vmatprep.subr.mxu0 %v2537_v51 }
 0x227   :  { %2413 = vmatmul.mubr.msk.bf16.gmra.mxu1 %vm750_vm12, %v2153_v14  ;;  %2445 = vmatpush3.msra.mxu0 %v1864_v25 }
 0x228   :  { %2446 = vmatprep.subr.mxu0 %v2537_v51 }
 0x229   :  { %2447 = vmatpush3.msra.mxu0 %v1863_v54 }
 0x243   :  { %v2322_v24 = vpop.f32.mrf.mxu0 }
 0x245   :  { %v809_v42 = vpop.f32.mrf.mxu0 }
 0x247   :  { %v2323_v12 = vpop.f32.mrf.mxu0 }
 0x249   :  { %v812_v32 = vpop.f32.mrf.mxu0 }
 0x256   :  { %v2382_v23 = vpop.f32.mrf.mxu0 }
 0x258   :  { %v1462_v33 = vpop.f32.mrf.mxu0 }
 0x25a   :  { %v2383_v61 = vpop.f32.mrf.mxu0 }
 0x260   :  { %v3649_v22 = vpop.f32.mrf.mxu1 }
 0x262   :  { %v3651_v45 = vpop.f32.mrf.mxu1 }
 0x264   :  { %v3659_v52 = vpop.f32.mrf.mxu1 }
 0x266   :  { %v828_v6 = vpop.f32.mrf.mxu1 }
 0x275   :  { %v2330_v53 = vpop.f32.mrf.mxu1 }
 0x277   :  { %v841_v55 = vpop.f32.mrf.mxu1 }
 0x279   :  { %v2331_v16 = vpop.f32.mrf.mxu1 }
 0x27b   :  { %v844_v11 = vpop.f32.mrf.mxu1 }
 0x27d   :  { %v2334_v40 = vpop.f32.mrf.mxu1 }
 0x27f   :  { %v3685_v20 = vpop.f32.mrf.mxu1 }
 0x281   :  { %v3690_v30 = vpop.f32.mrf.mxu1 }
 0x283   :  { %v3695_v14 = vpop.f32.mrf.mxu1 }
 0x28f   :  { %v2342_v43 = vpop.f32.mrf.mxu1 }
 0x290   :  { %v959_v10 = vadd.f32 %v2342_v43, %v2322_v24 }
 0x291   :  { %v950_v17 = vpop.f32.mrf.mxu1 }
 0x292   :  { %v951_v13 = vadd.f32 %v950_v17, %v809_v42  ;;  %v3750_v42 = vld [vmem:[#allocation4 + $0x8] sm:$0xff] }
 0x293   :  { %v2343_v26 = vpop.f32.mrf.mxu1 }
 0x294   :  { %v962_v50 = vadd.f32 %v2343_v26, %v2323_v12 }
 0x295   :  { %v953_v19 = vpop.f32.mrf.mxu1 }
 0x296   :  { %v954_v41 = vadd.f32 %v953_v19, %v812_v32 }
 0x297   :  { %v2346_v59 = vpop.f32.mrf.mxu1 }
 0x298   :  { %v3710_v9 = vadd.f32 %v2346_v59, %v3649_v22 }
 0x299   :  { %v966_v62 = vpop.f32.mrf.mxu1 }
 0x29a   :  { %v3713_v44 = vadd.f32 %v966_v62, %v3651_v45 }
 0x29b   :  { %v2347_v15 = vpop.f32.mrf.mxu1 }
 0x29c   :  { %v3716_v0 = vadd.f32 %v2347_v15, %v3659_v52  ;;  %v1465_v52 = vpop.f32.mrf.mxu0 }
 0x29d   :  { %v969_v49 = vpop.f32.mrf.mxu1 }
 0x29e   :  { %v3718_v46 = vadd.f32 %v969_v49, %v828_v6  ;;  %v2386_v6 = vpop.f32.mrf.mxu0 }
 0x29f   :  { %v2350_v48 = vpop.f32.mrf.mxu1 }
 0x2a0   :  { %v3720_v8 = vadd.f32 %v2350_v48, %v2330_v53  ;;  %v1478_v28 = vpop.f32.mrf.mxu0  ;;  %v3746_v48 = vld [vmem:[#allocation4] sm:$0xff] }
 0x2a1   :  { %v982_v27 = vpop.f32.mrf.mxu1 }
 0x2a2   :  { %v3722_v29 = vadd.f32 %v982_v27, %v841_v55  ;;  %v2387_v58 = vpop.f32.mrf.mxu0 }
 0x2a3   :  { %v2351_v3 = vpop.f32.mrf.mxu1 }
 0x2a4   :  { %v3724_v47 = vadd.f32 %v2351_v3, %v2331_v16  ;;  %v1481_v54 = vpop.f32.mrf.mxu0 }
 0x2a5   :  { %v985_v5 = vpop.f32.mrf.mxu1 }
 0x2a6   :  { %v3726_v37 = vadd.f32 %v985_v5, %v844_v11  ;;  %v2390_v43 = vpop.f32.mrf.mxu0 }
 0x2a7   :  { %v2354_v34 = vpop.f32.mrf.mxu1 }
 0x2a8   :  { %v3728_v35 = vadd.f32 %v2354_v34, %v2334_v40  ;;  %v1494_v32 = vpop.f32.mrf.mxu0 }
 0x2a9   :  { %v3730_v1 = vpop.f32.mrf.mxu1 }
 0x2ab   :  { %v3732_v56 = vpop.f32.mrf.mxu1 }
 0x2ad   :  { %v3734_v4 = vpop.f32.mrf.mxu1 }
 0x2af   :  { %v2362_v36 = vpop.f32.mrf.mxu1 }
 0x2b0   :  { %v1231_v11 = vadd.f32 %v2362_v36, %v959_v10 }
 0x2b1   :  { %v1166_v2 = vpop.f32.mrf.mxu1 }
 0x2b2   :  { %v1229_v31 = vadd.f32 %v1166_v2, %v951_v13  ;;  %v1527_v25 = vadd.f32 %v2382_v23, %v1231_v11  ;;  %v2391_v13 = vpop.f32.mrf.mxu0 }
 0x2b3   :  { %v2363_v63 = vpop.f32.mrf.mxu1 }
 0x2b4   :  { %v1232_v60 = vadd.f32 %v2363_v63, %v962_v50  ;;  %v1525_v49 = vadd.f32 %v1462_v33, %v1229_v31 }
 0x2b5   :  { %v1169_v7 = vpop.f32.mrf.mxu1 }
 0x2b6   :  { %v1230_v62 = vadd.f32 %v1169_v7, %v954_v41  ;;  %v1528_v24 = vadd.f32 %v2383_v61, %v1232_v60 }
 0x2b7   :  { %v2366_v22 = vpop.f32.mrf.mxu1 }
 0x2b8   :  { %v1235_v3 = vadd.f32 %v2366_v22, %v3710_v9  ;;  %v1526_v12 = vadd.f32 %v1465_v52, %v1230_v62  ;;  %v1497_v62 = vpop.f32.mrf.mxu0 }
 0x2b9   :  { %v1182_v45 = vpop.f32.mrf.mxu1 }
 0x2ba   :  { %v1233_v26 = vadd.f32 %v1182_v45, %v3713_v44  ;;  %v1531_v33 = vadd.f32 %v2386_v6, %v1235_v3 }
 0x2bb   :  { %v2367_v51 = vpop.f32.mrf.mxu1 }
 0x2bc   :  { %v1236_v7 = vadd.f32 %v2367_v51, %v3716_v0  ;;  %v1529_v22 = vadd.f32 %v1478_v28, %v1233_v26  ;;  %v999_v0 = vadd.f32 %v3730_v1, %v3685_v20  ;;  %v1010_v51 = vadd.f32 %v3732_v56, %v3690_v30 }
 0x2bd   :  { %v1185_v39 = vpop.f32.mrf.mxu1 }
 0x2be   :  { %v1234_v44 = vadd.f32 %v1185_v39, %v3718_v46  ;;  %v1532_v39 = vadd.f32 %v2387_v58, %v1236_v7 }
 0x2bf   :  { %v2370_v18 = vpop.f32.mrf.mxu1 }
 0x2c0   :  { %v1239_v52 = vadd.f32 %v2370_v18, %v3720_v8  ;;  %v1530_v18 = vadd.f32 %v1481_v54, %v1234_v44 }
 0x2c1   :  { %v1198_v38 = vpop.f32.mrf.mxu1 }
 0x2c2   :  { %v1237_v46 = vadd.f32 %v1198_v38, %v3722_v29  ;;  %v1535_v1 = vadd.f32 %v2390_v43, %v1239_v52  ;;  %v2394_v38 = vpop.f32.mrf.mxu0 }
 0x2c3   :  { %v2371_v57 = vpop.f32.mrf.mxu1 }
 0x2c4   :  { %v1240_v28 = vadd.f32 %v2371_v57, %v3724_v47  ;;  %v1533_v58 = vadd.f32 %v1494_v32, %v1237_v46 }
 0x2c5   :  { %v3736_v53 = vpop.f32.mrf.mxu1 }
 0x2c6   :  { %v1238_v47 = vadd.f32 %v3736_v53, %v3726_v37  ;;  %v1536_v3 = vadd.f32 %v2391_v13, %v1240_v28 }
 0x2c7   :  { %v3738_v55 = vpop.f32.mrf.mxu1 }
 0x2c8   :  { %v1243_v57 = vadd.f32 %v3738_v55, %v3728_v35  ;;  %v1510_v55 = vpop.f32.mrf.mxu0  ;;  %v1534_v32 = vadd.f32 %v1497_v62, %v1238_v47 }
 0x2c9   :  { %v3740_v16 = vpop.f32.mrf.mxu1 }
 0x2ca   :  { %v1241_v26 = vadd.f32 %v3740_v16, %v999_v0  ;;  %v1539_v7 = vadd.f32 %v2394_v38, %v1243_v57 }
 0x2cb   :  { %v3742_v40 = vpop.f32.mrf.mxu1 }
 0x2cc   :  { %v1537_v13 = vadd.f32 %v1510_v55, %v1241_v26 }
 0x2cd   :  { %v3744_v21 = vpop.f32.mrf.mxu1 }
 0x2cf   :  { %v2402_v59 = vpop.f32.mrf.mxu1 }
 0x2d0   :  { %v1759_v15 = vadd.f32 %v2402_v59, %v1527_v25 }
 0x2d1   :  { %v1694_v17 = vpop.f32.mrf.mxu1 }
 0x2d2   :  { %v1757_v27 = vadd.f32 %v1694_v17, %v1525_v49  ;;  %v1777_v19 = vadd.f32 %v3746_v48, %v1759_v15  ;;  %v1002_v15 = vadd.f32 %v3734_v4, %v3695_v14 }
 0x2d3   :  { %v2403_v5 = vpop.f32.mrf.mxu1 }
 0x2d4   :  { %v1760_v34 = vadd.f32 %v2403_v5, %v1528_v24  ;;  %v1775_v2 = vadd.f32 %v3746_v48, %v1757_v27  ;;  %v1793_v45 = vmax.f32 %v1777_v19, 0.0 }
 0x2d5   :  { %v1697_v36 = vpop.f32.mrf.mxu1 }
 0x2d6   :  { %v1778_v23 = vadd.f32 %v3750_v42, %v1760_v34  ;;  %v1758_v63 = vadd.f32 %v1697_v36, %v1526_v12  ;;  %v1791_v31 = vmax.f32 %v1775_v2, 0.0 }
 0x2d7   :  { %v2406_v9 = vpop.f32.mrf.mxu1 }
 0x2d8   :  { %v1794_v61 = vmax.f32 %v1778_v23, 0.0  ;;  %v1776_v10 = vadd.f32 %v3750_v42, %v1758_v63  ;;  %v1763_v11 = vadd.f32 %v2406_v9, %v1531_v33  ;;  %v1244_v33 = vadd.f32 %v3742_v40, %v1010_v51 }
 0x2d9   :  { %v1710_v50 = vpop.f32.mrf.mxu1 }
 0x2da   :  { %v1814_v41 = vmax.f32 %v1793_v45, %v1794_v61  ;;  %v1792_v60 = vmax.f32 %v1776_v10, 0.0  ;;  %v1761_v25 = vadd.f32 %v1710_v50, %v1529_v22  ;;  %v1781_v49 = vadd.f32 %v3746_v48, %v1763_v11 }
 0x2db   :  { %v2407_v6 = vpop.f32.mrf.mxu1 }
 0x2dc   :  { %v1815_v59 = vrot.slane %v1814_v41, 4  ;;  %v1807_v8 = vmax.f32 %v1791_v31, %v1792_v60  ;;  %v1764_v17 = vadd.f32 %v2407_v6, %v1532_v39  ;;  %v1779_v29 = vadd.f32 %v3746_v48, %v1761_v25 }
 0x2dd   :  { %v1713_v20 = vpop.f32.mrf.mxu1  ;;  %v1797_v5 = vmax.f32 %v1781_v49, 0.0  ;;  %v1242_v60 = vadd.f32 %v3744_v21, %v1002_v15 }
 0x2de   :  { %v1816_v27 = vmax.f32 %v1814_v41, %v1815_v59  ;;  %v1808_v30 = vrot.slane %v1807_v8, 4  ;;  %v1762_v56 = vadd.f32 %v1713_v20, %v1530_v18  ;;  %v1782_v14 = vadd.f32 %v3750_v42, %v1764_v17  ;;  %v2395_v41 = vpop.f32.mrf.mxu0 }
 0x2df   :  { %v2410_v4 = vpop.f32.mrf.mxu1  ;;  %v1795_v36 = vmax.f32 %v1779_v29, 0.0  ;;  %v1540_v49 = vadd.f32 %v2395_v41, %v1244_v33 }
 0x2e0   :  { %v1817_v54 = vrot.slane %v1816_v27, 2  ;;  %v1809_v24 = vmax.f32 %v1807_v8, %v1808_v30  ;;  %v1780_v43 = vadd.f32 %v3750_v42, %v1762_v56  ;;  %v1798_v19 = vmax.f32 %v1782_v14, 0.0  ;;  %v1513_v15 = vpop.f32.mrf.mxu0 }
 0x2e1   :  { %v1767_v34 = vadd.f32 %v2410_v4, %v1535_v1  ;;  %v1726_v12 = vpop.f32.mrf.mxu1  ;;  %v1538_v4 = vadd.f32 %v1513_v15, %v1242_v60 }
 0x2e2   :  { %v1818_v37 = vmax.f32 %v1816_v27, %v1817_v54  ;;  %v1810_v53 = vrot.slane %v1809_v24, 2  ;;  %v1796_v35 = vmax.f32 %v1780_v43, 0.0  ;;  %v1828_v2 = vmax.f32 %v1797_v5, %v1798_v19 }
 0x2e3   :  { %v1765_v23 = vadd.f32 %v1726_v12, %v1533_v58  ;;  %v2411_v63 = vpop.f32.mrf.mxu1  ;;  %v1785_v45 = vadd.f32 %v3746_v48, %v1767_v34 }
 0x2e4   :  { %v1819_v9 = vrot.slane %v1818_v37, 1  ;;  %v1811_v22 = vmax.f32 %v1809_v24, %v1810_v53  ;;  %v1821_v44 = vmax.f32 %v1795_v36, %v1796_v35  ;;  %v1829_v16 = vrot.slane %v1828_v2, 4 }
 0x2e5   :  { %v1768_v61 = vadd.f32 %v2411_v63, %v1536_v3  ;;  %v1729_v10 = vpop.f32.mrf.mxu1  ;;  %v1783_v50 = vadd.f32 %v3746_v48, %v1765_v23  ;;  %v1801_v8 = vmax.f32 %v1785_v45, 0.0 }
 0x2e6   :  { %v1812_v52 = vrot.slane %v1811_v22, 1  ;;  %v1822_v11 = vrot.slane %v1821_v44, 4  ;;  %v1766_v31 = vadd.f32 %v1729_v10, %v1534_v32  ;;  %v1820_v25 = vmax.f32 %v1818_v37, %v1819_v9 }
 0x2e7   :  { %v1830_v0 = vmax.f32 %v1828_v2, %v1829_v16  ;;  %v1786_v40 = vadd.f32 %v3750_v42, %v1768_v61  ;;  %v2414_v51 = vpop.f32.mrf.mxu1  ;;  %v1799_v1 = vmax.f32 %v1783_v50, 0.0 }
 0x2e8   :  { %v1813_v46 = vmax.f32 %v1811_v22, %v1812_v52  ;;  %v1823_v39 = vmax.f32 %v1821_v44, %v1822_v11  ;;  %v1784_v6 = vadd.f32 %v3750_v42, %v1766_v31  ;;  %v1771_v28 = vadd.f32 %v2414_v51, %v1539_v7 }
 0x2e9   :  { %v1831_v59 = vrot.slane %v1830_v0, 2  ;;  %v1802_v18 = vmax.f32 %v1786_v40, 0.0  ;;  %v1742_v62 = vpop.f32.mrf.mxu1 }
 0x2ea   :  { %v1895_v17 = vsel %vm1894_vm2, %v1820_v25, %v1813_v46  ;;  %v1824_v20 = vrot.slane %v1823_v39, 2  ;;  %v1800_v21 = vmax.f32 %v1784_v6, 0.0  ;;  %v1789_v29 = vadd.f32 %v3746_v48, %v1771_v28 }
 0x2eb   :  { %v1832_v27 = vmax.f32 %v1830_v0, %v1831_v59  ;;  %v1842_v30 = vmax.f32 %v1801_v8, %v1802_v18  ;;  %v1769_v56 = vadd.f32 %v1742_v62, %v1537_v13  ;;  %v2415_v38 = vpop.f32.mrf.mxu1  ;;  %v2164_v59 = vld [vmem:[%s3798_s5] ss:$0 sm:$0xff] }
 0x2ec   :  { %v1825_v47 = vmax.f32 %v1823_v39, %v1824_v20  ;;  %v1835_v57 = vmax.f32 %v1799_v1, %v1800_v21  ;;  %v1772_v14 = vadd.f32 %v2415_v38, %v1540_v49  ;;  %v1805_v12 = vmax.f32 %v1789_v29, 0.0 }
 0x2ed   :  { %v1833_v58 = vrot.slane %v1832_v27, 1  ;;  %v1843_v54 = vrot.slane %v1842_v30, 4  ;;  %v1787_v24 = vadd.f32 %v3746_v48, %v1769_v56  ;;  %v1745_v43 = vpop.f32.mrf.mxu1 }
 0x2ee   :  { %v1826_v3 = vrot.slane %v1825_v47, 1  ;;  %v1836_v26 = vrot.slane %v1835_v57, 4  ;;  %v1790_v5 = vadd.f32 %v3750_v42, %v1772_v14  ;;  %v1770_v19 = vadd.f32 %v1745_v43, %v1538_v4 }
 0x2ef   :  { %v1844_v34 = vmax.f32 %v1842_v30, %v1843_v54  ;;  %v1834_v55 = vmax.f32 %v1832_v27, %v1833_v58  ;;  %v1803_v23 = vmax.f32 %v1787_v24, 0.0 }
 0x2f0   :  { %v1827_v37 = vmax.f32 %v1825_v47, %v1826_v3  ;;  %v1837_v53 = vmax.f32 %v1835_v57, %v1836_v26  ;;  %v1806_v36 = vmax.f32 %v1790_v5, 0.0  ;;  %v1788_v35 = vadd.f32 %v3750_v42, %v1770_v19 }
 0x2f1   :  { %v1845_v2 = vrot.slane %v1844_v34, 2 }
 0x2f2   :  { %v1897_v63 = vsel %vm1896_vm3, %v1827_v37, %v1895_v17  ;;  %v1838_v48 = vrot.slane %v1837_v53, 2  ;;  %v1856_v32 = vmax.f32 %v1805_v12, %v1806_v36  ;;  %v1804_v7 = vmax.f32 %v1788_v35, 0.0 }
 0x2f3   :  { %v1846_v33 = vmax.f32 %v1844_v34, %v1845_v2  ;;  %v1899_v9 = vsel %vm1898_vm4, %v1834_v55, %v1897_v63 }
 0x2f4   :  { %v1839_v22 = vmax.f32 %v1837_v53, %v1838_v48  ;;  %v1857_v44 = vrot.slane %v1856_v32, 4  ;;  %v1849_v16 = vmax.f32 %v1803_v23, %v1804_v7 }
 0x2f5   :  { %v1847_v45 = vrot.slane %v1846_v33, 1 }
 0x2f6   :  { %v1840_v61 = vrot.slane %v1839_v22, 1  ;;  %v1858_v10 = vmax.f32 %v1856_v32, %v1857_v44  ;;  %v1850_v13 = vrot.slane %v1849_v16, 4 }
 0x2f7   :  { %v1848_v50 = vmax.f32 %v1846_v33, %v1847_v45 }
 0x2f8   :  { %v1841_v52 = vmax.f32 %v1839_v22, %v1840_v61  ;;  %v1859_v11 = vrot.slane %v1858_v10, 2  ;;  %v1851_v42 = vmax.f32 %v1849_v16, %v1850_v13 }
 0x2fa   :  { %v1860_v31 = vmax.f32 %v1858_v10, %v1859_v11  ;;  %v1852_v41 = vrot.slane %v1851_v42, 2  ;;  %v1901_v60 = vsel %vm1900_vm5, %v1841_v52, %v1899_v9 }
 0x2fb   :  { %v1903_v25 = vsel %vm1902_vm6, %v1848_v50, %v1901_v60 }
 0x2fc   :  { %v1853_v0 = vmax.f32 %v1851_v42, %v1852_v41  ;;  %v1861_v40 = vrot.slane %v1860_v31, 1 }
 0x2fe   :  { %v1854_v51 = vrot.slane %v1853_v0, 1  ;;  %v1862_v39 = vmax.f32 %v1860_v31, %v1861_v40 }
 0x300   :  { %v1855_v46 = vmax.f32 %v1853_v0, %v1854_v51 }
 0x302   :  { %v1905_v6 = vsel %vm1904_vm7, %v1855_v46, %v1903_v25 }
 0x303   :  { %v1907_v28 = vsel %vm1906_vm8, %v1862_v39, %v1905_v6 }
 0x304   :  { %2449 = vmatmul.mubr.f32.vlgmr.msra.gmra.mxu0 %v1907_v28 }
 0x3c4   :  { %v1975_v8 = vpop.f32.mrf.mxu0 }
 0x3c5   :  { %v1976_v18 = vadd.f32 %v2164_v59, %v1975_v8 }
 0x3c6   :  { %v2450_v62 = vpop.f32.mrf.mxu0 }
 0x3c7   :  { %1979 = vst [vmem:[%s3799_s6] sm:$0xff] %v1976_v18 }
 0x3c8   :  { %1984 = vsyncpa [#allocation3], 1 }
 0x3c9   :  { %1985 = vsyncpa [#allocation5], 1 }

</bundles_post_ra>
